<compile_context>
chip_gen: v6e
topology: v6e:2x2x1
jax: 0.10.0
libtpu: 0.0.40
codegen_flags: <defaults>
</compile_context>

<pallas_src>
import jax
import jax.numpy as jnp
import numpy as np
from jax import lax
from jax.experimental import pallas as pl
from jax.experimental.pallas import tpu as pltpu


# ---------------------------------------------------------------------------
# Fused kernel: deconv+relu -> conv5x5+relu -> dropout, one batch per step.
# ---------------------------------------------------------------------------
def _up_fused_kernel(seed_ref, x_ref, wd_ref, bd_ref, wb_ref, bc_ref,
                     o_ref, bank_ref):
    n = pl.program_id(0)
    H = x_ref.shape[1]          # input rows == rows per output parity slab
    L = o_ref.shape[3]          # 2*W*Cout, lane-dense (multiple of 128)

    # --- stage 1: ConvTranspose2d(k=2, s=2) as ONE lane-dense GEMM + ReLU ----
    # wd columns are ordered (kh, 2w+kw, cout), so row h of the result already
    # holds output rows 2h (first L lanes) and 2h+1 (last L lanes),
    # W-interleaved -- no in-kernel reshape/transpose needed.
    x2d = x_ref[0]                                              # (H, W*Cin)
    r = jnp.dot(x2d, wd_ref[...], preferred_element_type=jnp.float32)
    r = jnp.maximum(r + bd_ref[...], 0.0)                       # (H, 2*L)
    r_even = r[:, :L]                                           # y1 rows 0,2,...
    r_odd = r[:, L:]                                            # y1 rows 1,3,...

    # --- stage 2: parity-split, zero-padded row banks in VMEM ----------------
    # Rows 0 and H+1 of each bank are the 2-row halo of the 5x5 "same" conv
    # (kept zero), rows 1..H hold the deconv output -- no jnp.pad / HBM copy.
    bank_ref[...] = jnp.zeros_like(bank_ref)
    bank_ref[0, 1:H + 1, :] = r_even
    bank_ref[1, 1:H + 1, :] = r_odd

    # --- stage 3: Conv2d(5x5, stride=1, pad=2) as 10 banded GEMMs ------------
    # wb[dh] is a (L, L) banded matrix that applies all 5 kw taps and the
    # channel contraction (and the 2-column halo) in a single matmul.
    def mm(a, b):
        return jnp.dot(a, b, preferred_element_type=jnp.float32)

    out_even = (mm(bank_ref[0, 0:H, :],     wb_ref[0]) +
                mm(bank_ref[1, 0:H, :],     wb_ref[1]) +
                mm(bank_ref[0, 1:H + 1, :], wb_ref[2]) +
                mm(bank_ref[1, 1:H + 1, :], wb_ref[3]) +
                mm(bank_ref[0, 2:H + 2, :], wb_ref[4]))
    out_odd = (mm(bank_ref[1, 0:H, :],     wb_ref[0]) +
               mm(bank_ref[0, 1:H + 1, :], wb_ref[1]) +
               mm(bank_ref[1, 1:H + 1, :], wb_ref[2]) +
               mm(bank_ref[0, 2:H + 2, :], wb_ref[3]) +
               mm(bank_ref[1, 2:H + 2, :], wb_ref[4]))
    out_even = jnp.maximum(out_even + bc_ref[...], 0.0)
    out_odd = jnp.maximum(out_odd + bc_ref[...], 0.0)

    # --- stage 4: dropout(p=0.5, training) fused in the epilogue -------------
    # Counter-based hash (splitmix32-style finalizer) on plain uint32 vector
    # ops; batch index + parity are mixed in so masks differ per grid step.
    # TODO(synk): PyTorch's dropout uses a stateful global RNG; here the caller
    # must vary `seed` between calls to get fresh masks.
    seed_u = seed_ref[0].astype(jnp.uint32)
    n_u = n.astype(jnp.uint32)

    def dropout(vals, parity):
        rows = lax.broadcasted_iota(jnp.int32, vals.shape, 0).astype(jnp.uint32)
        cols = lax.broadcasted_iota(jnp.int32, vals.shape, 1).astype(jnp.uint32)
        idx = ((n_u * jnp.uint32(2) + jnp.uint32(parity)) * jnp.uint32(vals.shape[0])
               + rows) * jnp.uint32(vals.shape[1]) + cols
        h = idx * jnp.uint32(0x9E3779B9) + seed_u * jnp.uint32(0x85EBCA6B)
        h = h ^ (h >> 16)
        h = h * jnp.uint32(0x7FEB352D)
        h = h ^ (h >> 15)
        h = h * jnp.uint32(0x846CA68B)
        h = h ^ (h >> 16)
        keep = (h >> 31) == jnp.uint32(1)                       # p(keep) = 0.5
        return jnp.where(keep, vals * 2.0, 0.0)                 # inverted scaling

    o_ref[0, 0] = dropout(out_even, 0).astype(o_ref.dtype)
    o_ref[0, 1] = dropout(out_odd, 1).astype(o_ref.dtype)


# ---------------------------------------------------------------------------
# Weight re-layout helpers (tiny, trace-time; run on the parameters only).
# ---------------------------------------------------------------------------
def _deconv_as_gemm_weight(w_deconv, W):
    """(Cin, Cout, 2, 2) -> (W*Cin, 2*2W*Cout), columns ordered (kh, 2w+kw, c).

    Block-diagonal over w so that  (H, W*Cin) @ result  directly yields the
    W-interleaved, lane-dense deconv output rows (even rows | odd rows)."""
    Cin, Cout = w_deconv.shape[0], w_deconv.shape[1]
    wt = jnp.transpose(w_deconv, (0, 2, 3, 1))                  # (Cin, kh, kw, Cout)
    wd = jnp.zeros((W, Cin, 2, 2 * W, Cout), w_deconv.dtype)
    for w in range(W):                                          # trace-time loop
        wd = wd.at[w, :, :, 2 * w:2 * w + 2, :].set(wt)
    return wd.reshape(W * Cin, 2 * 2 * W * Cout)


def _conv5x5_banded_weights(w_conv, Wo):
    """(Cout, Cin, 5, 5) -> (5, Wo*Cin, Wo*Cout) banded matrices (one per row
    offset dh).  Each applies all 5 kw taps + the channel contraction in a
    single GEMM; out-of-range taps (the 2-column halo) are simply omitted."""
    Cout, Cin = w_conv.shape[0], w_conv.shape[1]
    w_hwio = jnp.transpose(w_conv, (2, 3, 1, 0))                # (5, 5, Cin, Cout)
    wb = jnp.zeros((5, Wo * Cin, Wo * Cout), w_conv.dtype)
    for j in range(Wo):                                         # trace-time loops
        for dw in range(5):
            q = j + dw - 2
            if 0 <= q < Wo:
                wb = wb.at[:, q * Cin:(q + 1) * Cin,
                           j * Cout:(j + 1) * Cout].set(w_hwio[:, dw])
    return wb


# ---------------------------------------------------------------------------
# Full Up.forward
# ---------------------------------------------------------------------------
@jax.jit
def up_forward(x_nchw, w_deconv, b_deconv, w_conv, b_conv, seed):
    N, Cin, H, W = x_nchw.shape
    Cout = w_deconv.shape[1]
    Ho, Wo = 2 * H, 2 * W
    L = Wo * Cout                                               # lane-dense width

    # NHWC rows with (w, cin) folded onto lanes (free row-major reshape).
    x_rows = jnp.transpose(x_nchw, (0, 2, 3, 1)).reshape(N, H, W * Cin)

    wd = _deconv_as_gemm_weight(w_deconv, W)                    # (W*Cin, 2*L)
    bd = jnp.tile(b_deconv, 2 * Wo).reshape(1, 2 * L)
    wb = _conv5x5_banded_weights(w_conv, Wo)                    # (5, L, L)
    bc = jnp.tile(b_conv, Wo).reshape(1, L)
    seed_arr = jnp.reshape(jnp.asarray(seed, dtype=jnp.int32), (1,))

    out = pl.pallas_call(
        _up_fused_kernel,
        out_shape=jax.ShapeDtypeStruct((N, 2, H, L), jnp.float32),
        grid=(N,),
        in_specs=[
            pl.BlockSpec(memory_space=pltpu.MemorySpace.SMEM),      # seed
            pl.BlockSpec((1, H, W * Cin), lambda n: (n, 0, 0)),     # x rows
            pl.BlockSpec((W * Cin, 2 * L), lambda n: (0, 0)),       # deconv GEMM w
            pl.BlockSpec((1, 2 * L), lambda n: (0, 0)),             # deconv bias
            pl.BlockSpec((5, L, L), lambda n: (0, 0, 0)),           # banded conv w
            pl.BlockSpec((1, L), lambda n: (0, 0)),                 # conv bias
        ],
        out_specs=pl.BlockSpec((1, 2, H, L), lambda n: (n, 0, 0, 0)),
        scratch_shapes=[pltpu.VMEM((2, H + 2, L), jnp.float32)],    # parity banks
        compiler_params=pltpu.CompilerParams(
            dimension_semantics=("parallel",)),
    )(seed_arr, x_rows, wd, bd, wb, bc)

    # Decode (parity, row, (w, cout)) back to NCHW.  This transpose is required
    # by the NCHW API anyway; there is no other XLA glue around the kernel.
    y = out.reshape(N, 2, H, Wo, Cout)
    y = jnp.transpose(y, (0, 2, 1, 3, 4)).reshape(N, Ho, Wo, Cout)
    return jnp.transpose(y, (0, 3, 1, 2))


if __name__ == "__main__":
    N, Cin, Cout, H, W = 2, 4, 8, 8, 8

    key = jax.random.PRNGKey(0)
    kx, kw1, kb1, kw2 = jax.random.split(key, 4)

    x_nchw = jax.random.normal(kx, (N, Cin, H, W), dtype=jnp.float32)

    # ConvTranspose2d(Cin, Cout, 2, stride=2) params (PyTorch layout (Cin, Cout, 2, 2)).
    lim_d = 1.0 / np.sqrt(Cin * 2 * 2)
    w_deconv = jax.random.uniform(kw1, (Cin, Cout, 2, 2), jnp.float32, -lim_d, lim_d)
    b_deconv = jax.random.uniform(kb1, (Cout,), jnp.float32, -lim_d, lim_d)

    # Conv2d(Cout, Cout, 5, padding=2): xavier_uniform_ weight, constant 0.1 bias.
    fan = Cout * 5 * 5
    lim_c = np.sqrt(6.0 / (fan + fan))
    w_conv = jax.random.uniform(kw2, (Cout, Cout, 5, 5), jnp.float32, -lim_c, lim_c)
    b_conv = jnp.full((Cout,), 0.1, dtype=jnp.float32)

    out_nchw = up_forward(x_nchw, w_deconv, b_deconv, w_conv, b_conv, 42)
    jax.block_until_ready(out_nchw)
    assert out_nchw.shape == (N, Cout, 2 * H, 2 * W)

    # --- pure-JAX reference for the pre-dropout activation --------------------
    x_nhwc = jnp.transpose(x_nchw, (0, 2, 3, 1))
    ref1 = jnp.zeros((N, 2 * H, 2 * W, Cout), jnp.float32)
    for kh in range(2):
        for kw in range(2):
            term = (x_nhwc[..., :, None] * w_deconv[None, None, None, :, :, kh, kw]).sum(3)
            ref1 = ref1.at[:, kh::2, kw::2, :].set(term)
    ref1 = jnp.maximum(ref1 + b_deconv, 0.0)

    xp = jnp.pad(ref1, ((0, 0), (2, 2), (2, 2), (0, 0)))
    w_hwio = jnp.transpose(w_conv, (2, 3, 1, 0))
    ref2 = jnp.zeros((N, 2 * H, 2 * W, Cout), jnp.float32)
    for kh in range(5):
        for kw in range(5):
            patch = xp[:, kh:kh + 2 * H, kw:kw + 2 * W, :]
            ref2 = ref2 + (patch[..., :, None] * w_hwio[kh, kw][None, None, None]).sum(3)
    ref2 = jnp.maximum(ref2 + b_conv, 0.0)

    out_nhwc = np.asarray(jnp.transpose(out_nchw, (0, 2, 3, 1)))
    ref2 = np.asarray(ref2)

    # dropout(p=0.5, training): every element must be 0 or 2x the conv output.
    target = 2.0 * ref2
    dist = np.minimum(np.abs(out_nhwc), np.abs(out_nhwc - target))
    np.testing.assert_array_less(dist, 2e-2 + 2e-2 * np.abs(target))

    # And the mask must actually drop roughly half of the clearly-positive values.
    big = target > 0.2
    assert int(big.sum()) > 100
    keep_frac = float(np.mean(np.abs(out_nhwc[big]) > 0.1))
    assert 0.25 < keep_frac < 0.75, keep_frac

    print("KERNEL_OK")
</pallas_src>

<mosaic_0001>
module attributes {stable_mosaic.version = 11 : i64} {
  func.func @_up_fused_kernel(%arg0: i32, %arg1: memref<1xi32, #tpu.memory_space<smem>>, %arg2: memref<1x8x32xf32, #tpu.memory_space<vmem>>, %arg3: memref<32x256xf32, #tpu.memory_space<vmem>>, %arg4: memref<1x256xf32, #tpu.memory_space<vmem>>, %arg5: memref<5x128x128xf32, #tpu.memory_space<vmem>>, %arg6: memref<1x128xf32, #tpu.memory_space<vmem>>, %arg7: memref<1x2x8x128xf32, #tpu.memory_space<vmem>>, %arg8: memref<2x10x128xf32, #tpu.memory_space<vmem>>) attributes {dimension_semantics = [#tpu.dimension_semantics<parallel>], iteration_bounds = array<i64: 2>, scalar_prefetch = 0 : i64, scratch_operands = 1 : i64, tpu.core_type = #tpu.core_type<tc>, window_params = [{transform_indices = @transform_0, window_bounds = array<i64: 1>}, {transform_indices = @transform_1, window_bounds = array<i64: 1, 8, 32>}, {pipeline_mode = #tpu.pipeline_mode<synchronous>, transform_indices = @transform_2, window_bounds = array<i64: 32, 256>}, {pipeline_mode = #tpu.pipeline_mode<synchronous>, transform_indices = @transform_3, window_bounds = array<i64: 1, 256>}, {pipeline_mode = #tpu.pipeline_mode<synchronous>, transform_indices = @transform_4, window_bounds = array<i64: 5, 128, 128>}, {pipeline_mode = #tpu.pipeline_mode<synchronous>, transform_indices = @transform_5, window_bounds = array<i64: 1, 128>}, {transform_indices = @transform_6, window_bounds = array<i64: 1, 2, 8, 128>}]} {
    %c0 = arith.constant 0 : index
    %c0_0 = arith.constant 0 : index
    %c0_1 = arith.constant 0 : index
    %0 = vector.load %arg2[%c0, %c0_0, %c0_1] : memref<1x8x32xf32, #tpu.memory_space<vmem>>, vector<1x8x32xf32>
    %1 = vector.shape_cast %0 : vector<1x8x32xf32> to vector<8x32xf32>
    %c0_2 = arith.constant 0 : index
    %c0_3 = arith.constant 0 : index
    %2 = vector.load %arg3[%c0_2, %c0_3] : memref<32x256xf32, #tpu.memory_space<vmem>>, vector<32x256xf32>
    %cst = arith.constant dense<0.000000e+00> : vector<8x256xf32>
    %3 = tpu.matmul %1, %2, %cst {dimension_numbers = #tpu.dot_dimension_numbers<[1], [0], [0], [1], [0, 0, 1, 1], [], []>} : vector<8x32xf32>, vector<32x256xf32>, vector<8x256xf32> -> vector<8x256xf32>
    %c0_4 = arith.constant 0 : index
    %c0_5 = arith.constant 0 : index
    %4 = vector.load %arg4[%c0_4, %c0_5] : memref<1x256xf32, #tpu.memory_space<vmem>>, vector<1x256xf32>
    %5 = vector.broadcast %4 : vector<1x256xf32> to vector<8x256xf32>
    %6 = arith.addf %3, %5 : vector<8x256xf32>
    %cst_6 = arith.constant 0.000000e+00 : f32
    %7 = vector.broadcast %cst_6 : f32 to vector<8x256xf32>
    %8 = arith.maximumf %6, %7 : vector<8x256xf32>
    %9 = vector.extract_strided_slice %8 {offsets = [0, 0], sizes = [8, 128], strides = [1, 1]} : vector<8x256xf32> to vector<8x128xf32>
    %10 = vector.extract_strided_slice %8 {offsets = [0, 128], sizes = [8, 128], strides = [1, 1]} : vector<8x256xf32> to vector<8x128xf32>
    %cst_7 = arith.constant 0.000000e+00 : f32
    %11 = vector.broadcast %cst_7 : f32 to vector<2x10x128xf32>
    %c0_8 = arith.constant 0 : index
    %c0_9 = arith.constant 0 : index
    %c0_10 = arith.constant 0 : index
    %12 = vector.load %arg8[%c0_8, %c0_9, %c0_10] : memref<2x10x128xf32, #tpu.memory_space<vmem>>, vector<2x10x128xf32>
    tpu.vector_store %arg8[%c0_8, %c0_9, %c0_10], %11 {strides = array<i32>} : memref<2x10x128xf32, #tpu.memory_space<vmem>>, vector<2x10x128xf32>,
    %c0_11 = arith.constant 0 : index
    %c1 = arith.constant 1 : index
    %c0_12 = arith.constant 0 : index
    %13 = vector.load %arg8[%c0_11, %c1, %c0_12] : memref<2x10x128xf32, #tpu.memory_space<vmem>>, vector<1x8x128xf32>
    %14 = vector.shape_cast %13 : vector<1x8x128xf32> to vector<8x128xf32>
    %15 = vector.shape_cast %9 : vector<8x128xf32> to vector<1x8x128xf32>
    tpu.vector_store %arg8[%c0_11, %c1, %c0_12], %15 {strides = array<i32>} : memref<2x10x128xf32, #tpu.memory_space<vmem>>, vector<1x8x128xf32>,
    %c1_13 = arith.constant 1 : index
    %c1_14 = arith.constant 1 : index
    %c0_15 = arith.constant 0 : index
    %16 = vector.load %arg8[%c1_13, %c1_14, %c0_15] : memref<2x10x128xf32, #tpu.memory_space<vmem>>, vector<1x8x128xf32>
    %17 = vector.shape_cast %16 : vector<1x8x128xf32> to vector<8x128xf32>
    %18 = vector.shape_cast %10 : vector<8x128xf32> to vector<1x8x128xf32>
    tpu.vector_store %arg8[%c1_13, %c1_14, %c0_15], %18 {strides = array<i32>} : memref<2x10x128xf32, #tpu.memory_space<vmem>>, vector<1x8x128xf32>,
    %c0_16 = arith.constant 0 : index
    %c0_17 = arith.constant 0 : index
    %c0_18 = arith.constant 0 : index
    %19 = vector.load %arg8[%c0_16, %c0_17, %c0_18] : memref<2x10x128xf32, #tpu.memory_space<vmem>>, vector<1x8x128xf32>
    %20 = vector.shape_cast %19 : vector<1x8x128xf32> to vector<8x128xf32>
    %c0_19 = arith.constant 0 : index
    %c0_20 = arith.constant 0 : index
    %c0_21 = arith.constant 0 : index
    %21 = vector.load %arg5[%c0_19, %c0_20, %c0_21] : memref<5x128x128xf32, #tpu.memory_space<vmem>>, vector<1x128x128xf32>
    %22 = vector.shape_cast %21 : vector<1x128x128xf32> to vector<128x128xf32>
    %cst_22 = arith.constant dense<0.000000e+00> : vector<8x128xf32>
    %23 = tpu.matmul %20, %22, %cst_22 {dimension_numbers = #tpu.dot_dimension_numbers<[1], [0], [0], [1], [0, 0, 1, 1], [], []>} : vector<8x128xf32>, vector<128x128xf32>, vector<8x128xf32> -> vector<8x128xf32>
    %c1_23 = arith.constant 1 : index
    %c0_24 = arith.constant 0 : index
    %c0_25 = arith.constant 0 : index
    %24 = vector.load %arg8[%c1_23, %c0_24, %c0_25] : memref<2x10x128xf32, #tpu.memory_space<vmem>>, vector<1x8x128xf32>
    %25 = vector.shape_cast %24 : vector<1x8x128xf32> to vector<8x128xf32>
    %c1_26 = arith.constant 1 : index
    %c0_27 = arith.constant 0 : index
    %c0_28 = arith.constant 0 : index
    %26 = vector.load %arg5[%c1_26, %c0_27, %c0_28] : memref<5x128x128xf32, #tpu.memory_space<vmem>>, vector<1x128x128xf32>
    %27 = vector.shape_cast %26 : vector<1x128x128xf32> to vector<128x128xf32>
    %cst_29 = arith.constant dense<0.000000e+00> : vector<8x128xf32>
    %28 = tpu.matmul %25, %27, %cst_29 {dimension_numbers = #tpu.dot_dimension_numbers<[1], [0], [0], [1], [0, 0, 1, 1], [], []>} : vector<8x128xf32>, vector<128x128xf32>, vector<8x128xf32> -> vector<8x128xf32>
    %29 = arith.addf %23, %28 : vector<8x128xf32>
    %c0_30 = arith.constant 0 : index
    %c1_31 = arith.constant 1 : index
    %c0_32 = arith.constant 0 : index
    %30 = vector.load %arg8[%c0_30, %c1_31, %c0_32] : memref<2x10x128xf32, #tpu.memory_space<vmem>>, vector<1x8x128xf32>
    %31 = vector.shape_cast %30 : vector<1x8x128xf32> to vector<8x128xf32>
    %c2 = arith.constant 2 : index
    %c0_33 = arith.constant 0 : index
    %c0_34 = arith.constant 0 : index
    %32 = vector.load %arg5[%c2, %c0_33, %c0_34] : memref<5x128x128xf32, #tpu.memory_space<vmem>>, vector<1x128x128xf32>
    %33 = vector.shape_cast %32 : vector<1x128x128xf32> to vector<128x128xf32>
    %cst_35 = arith.constant dense<0.000000e+00> : vector<8x128xf32>
    %34 = tpu.matmul %31, %33, %cst_35 {dimension_numbers = #tpu.dot_dimension_numbers<[1], [0], [0], [1], [0, 0, 1, 1], [], []>} : vector<8x128xf32>, vector<128x128xf32>, vector<8x128xf32> -> vector<8x128xf32>
    %35 = arith.addf %29, %34 : vector<8x128xf32>
    %c1_36 = arith.constant 1 : index
    %c1_37 = arith.constant 1 : index
    %c0_38 = arith.constant 0 : index
    %36 = vector.load %arg8[%c1_36, %c1_37, %c0_38] : memref<2x10x128xf32, #tpu.memory_space<vmem>>, vector<1x8x128xf32>
    %37 = vector.shape_cast %36 : vector<1x8x128xf32> to vector<8x128xf32>
    %c3 = arith.constant 3 : index
    %c0_39 = arith.constant 0 : index
    %c0_40 = arith.constant 0 : index
    %38 = vector.load %arg5[%c3, %c0_39, %c0_40] : memref<5x128x128xf32, #tpu.memory_space<vmem>>, vector<1x128x128xf32>
    %39 = vector.shape_cast %38 : vector<1x128x128xf32> to vector<128x128xf32>
    %cst_41 = arith.constant dense<0.000000e+00> : vector<8x128xf32>
    %40 = tpu.matmul %37, %39, %cst_41 {dimension_numbers = #tpu.dot_dimension_numbers<[1], [0], [0], [1], [0, 0, 1, 1], [], []>} : vector<8x128xf32>, vector<128x128xf32>, vector<8x128xf32> -> vector<8x128xf32>
    %41 = arith.addf %35, %40 : vector<8x128xf32>
    %c0_42 = arith.constant 0 : index
    %c2_43 = arith.constant 2 : index
    %c0_44 = arith.constant 0 : index
    %42 = vector.load %arg8[%c0_42, %c2_43, %c0_44] : memref<2x10x128xf32, #tpu.memory_space<vmem>>, vector<1x8x128xf32>
    %43 = vector.shape_cast %42 : vector<1x8x128xf32> to vector<8x128xf32>
    %c4 = arith.constant 4 : index
    %c0_45 = arith.constant 0 : index
    %c0_46 = arith.constant 0 : index
    %44 = vector.load %arg5[%c4, %c0_45, %c0_46] : memref<5x128x128xf32, #tpu.memory_space<vmem>>, vector<1x128x128xf32>
    %45 = vector.shape_cast %44 : vector<1x128x128xf32> to vector<128x128xf32>
    %cst_47 = arith.constant dense<0.000000e+00> : vector<8x128xf32>
    %46 = tpu.matmul %43, %45, %cst_47 {dimension_numbers = #tpu.dot_dimension_numbers<[1], [0], [0], [1], [0, 0, 1, 1], [], []>} : vector<8x128xf32>, vector<128x128xf32>, vector<8x128xf32> -> vector<8x128xf32>
    %47 = arith.addf %41, %46 : vector<8x128xf32>
    %c1_48 = arith.constant 1 : index
    %c0_49 = arith.constant 0 : index
    %c0_50 = arith.constant 0 : index
    %48 = vector.load %arg8[%c1_48, %c0_49, %c0_50] : memref<2x10x128xf32, #tpu.memory_space<vmem>>, vector<1x8x128xf32>
    %49 = vector.shape_cast %48 : vector<1x8x128xf32> to vector<8x128xf32>
    %c0_51 = arith.constant 0 : index
    %c0_52 = arith.constant 0 : index
    %c0_53 = arith.constant 0 : index
    %50 = vector.load %arg5[%c0_51, %c0_52, %c0_53] : memref<5x128x128xf32, #tpu.memory_space<vmem>>, vector<1x128x128xf32>
    %51 = vector.shape_cast %50 : vector<1x128x128xf32> to vector<128x128xf32>
    %cst_54 = arith.constant dense<0.000000e+00> : vector<8x128xf32>
    %52 = tpu.matmul %49, %51, %cst_54 {dimension_numbers = #tpu.dot_dimension_numbers<[1], [0], [0], [1], [0, 0, 1, 1], [], []>} : vector<8x128xf32>, vector<128x128xf32>, vector<8x128xf32> -> vector<8x128xf32>
    %c0_55 = arith.constant 0 : index
    %c1_56 = arith.constant 1 : index
    %c0_57 = arith.constant 0 : index
    %53 = vector.load %arg8[%c0_55, %c1_56, %c0_57] : memref<2x10x128xf32, #tpu.memory_space<vmem>>, vector<1x8x128xf32>
    %54 = vector.shape_cast %53 : vector<1x8x128xf32> to vector<8x128xf32>
    %c1_58 = arith.constant 1 : index
    %c0_59 = arith.constant 0 : index
    %c0_60 = arith.constant 0 : index
    %55 = vector.load %arg5[%c1_58, %c0_59, %c0_60] : memref<5x128x128xf32, #tpu.memory_space<vmem>>, vector<1x128x128xf32>
    %56 = vector.shape_cast %55 : vector<1x128x128xf32> to vector<128x128xf32>
    %cst_61 = arith.constant dense<0.000000e+00> : vector<8x128xf32>
    %57 = tpu.matmul %54, %56, %cst_61 {dimension_numbers = #tpu.dot_dimension_numbers<[1], [0], [0], [1], [0, 0, 1, 1], [], []>} : vector<8x128xf32>, vector<128x128xf32>, vector<8x128xf32> -> vector<8x128xf32>
    %58 = arith.addf %52, %57 : vector<8x128xf32>
    %c1_62 = arith.constant 1 : index
    %c1_63 = arith.constant 1 : index
    %c0_64 = arith.constant 0 : index
    %59 = vector.load %arg8[%c1_62, %c1_63, %c0_64] : memref<2x10x128xf32, #tpu.memory_space<vmem>>, vector<1x8x128xf32>
    %60 = vector.shape_cast %59 : vector<1x8x128xf32> to vector<8x128xf32>
    %c2_65 = arith.constant 2 : index
    %c0_66 = arith.constant 0 : index
    %c0_67 = arith.constant 0 : index
    %61 = vector.load %arg5[%c2_65, %c0_66, %c0_67] : memref<5x128x128xf32, #tpu.memory_space<vmem>>, vector<1x128x128xf32>
    %62 = vector.shape_cast %61 : vector<1x128x128xf32> to vector<128x128xf32>
    %cst_68 = arith.constant dense<0.000000e+00> : vector<8x128xf32>
    %63 = tpu.matmul %60, %62, %cst_68 {dimension_numbers = #tpu.dot_dimension_numbers<[1], [0], [0], [1], [0, 0, 1, 1], [], []>} : vector<8x128xf32>, vector<128x128xf32>, vector<8x128xf32> -> vector<8x128xf32>
    %64 = arith.addf %58, %63 : vector<8x128xf32>
    %c0_69 = arith.constant 0 : index
    %c2_70 = arith.constant 2 : index
    %c0_71 = arith.constant 0 : index
    %65 = vector.load %arg8[%c0_69, %c2_70, %c0_71] : memref<2x10x128xf32, #tpu.memory_space<vmem>>, vector<1x8x128xf32>
    %66 = vector.shape_cast %65 : vector<1x8x128xf32> to vector<8x128xf32>
    %c3_72 = arith.constant 3 : index
    %c0_73 = arith.constant 0 : index
    %c0_74 = arith.constant 0 : index
    %67 = vector.load %arg5[%c3_72, %c0_73, %c0_74] : memref<5x128x128xf32, #tpu.memory_space<vmem>>, vector<1x128x128xf32>
    %68 = vector.shape_cast %67 : vector<1x128x128xf32> to vector<128x128xf32>
    %cst_75 = arith.constant dense<0.000000e+00> : vector<8x128xf32>
    %69 = tpu.matmul %66, %68, %cst_75 {dimension_numbers = #tpu.dot_dimension_numbers<[1], [0], [0], [1], [0, 0, 1, 1], [], []>} : vector<8x128xf32>, vector<128x128xf32>, vector<8x128xf32> -> vector<8x128xf32>
    %70 = arith.addf %64, %69 : vector<8x128xf32>
    %c1_76 = arith.constant 1 : index
    %c2_77 = arith.constant 2 : index
    %c0_78 = arith.constant 0 : index
    %71 = vector.load %arg8[%c1_76, %c2_77, %c0_78] : memref<2x10x128xf32, #tpu.memory_space<vmem>>, vector<1x8x128xf32>
    %72 = vector.shape_cast %71 : vector<1x8x128xf32> to vector<8x128xf32>
    %c4_79 = arith.constant 4 : index
    %c0_80 = arith.constant 0 : index
    %c0_81 = arith.constant 0 : index
    %73 = vector.load %arg5[%c4_79, %c0_80, %c0_81] : memref<5x128x128xf32, #tpu.memory_space<vmem>>, vector<1x128x128xf32>
    %74 = vector.shape_cast %73 : vector<1x128x128xf32> to vector<128x128xf32>
    %cst_82 = arith.constant dense<0.000000e+00> : vector<8x128xf32>
    %75 = tpu.matmul %72, %74, %cst_82 {dimension_numbers = #tpu.dot_dimension_numbers<[1], [0], [0], [1], [0, 0, 1, 1], [], []>} : vector<8x128xf32>, vector<128x128xf32>, vector<8x128xf32> -> vector<8x128xf32>
    %76 = arith.addf %70, %75 : vector<8x128xf32>
    %c0_83 = arith.constant 0 : index
    %c0_84 = arith.constant 0 : index
    %77 = vector.load %arg6[%c0_83, %c0_84] : memref<1x128xf32, #tpu.memory_space<vmem>>, vector<1x128xf32>
    %78 = vector.broadcast %77 : vector<1x128xf32> to vector<8x128xf32>
    %79 = arith.addf %47, %78 : vector<8x128xf32>
    %cst_85 = arith.constant 0.000000e+00 : f32
    %80 = vector.broadcast %cst_85 : f32 to vector<8x128xf32>
    %81 = arith.maximumf %79, %80 : vector<8x128xf32>
    %c0_86 = arith.constant 0 : index
    %c0_87 = arith.constant 0 : index
    %82 = vector.load %arg6[%c0_86, %c0_87] : memref<1x128xf32, #tpu.memory_space<vmem>>, vector<1x128xf32>
    %83 = vector.broadcast %82 : vector<1x128xf32> to vector<8x128xf32>
    %84 = arith.addf %76, %83 : vector<8x128xf32>
    %cst_88 = arith.constant 0.000000e+00 : f32
    %85 = vector.broadcast %cst_88 : f32 to vector<8x128xf32>
    %86 = arith.maximumf %84, %85 : vector<8x128xf32>
    %c0_89 = arith.constant 0 : index
    %87 = memref.load %arg1[%c0_89] : memref<1xi32, #tpu.memory_space<smem>>
    %88 = tpu.iota {dimensions = array<i32: 0>} : vector<8x128xi32>
    %89 = tpu.iota {dimensions = array<i32: 1>} : vector<8x128xi32>
    %c2_i32 = arith.constant 2 : i32
    %90 = arith.muli %arg0, %c2_i32 : i32
    %c0_i32 = arith.constant 0 : i32
    %91 = arith.addi %90, %c0_i32 : i32
    %c8_i32 = arith.constant 8 : i32
    %92 = arith.muli %91, %c8_i32 : i32
    %93 = vector.broadcast %92 : i32 to vector<8x128xi32>
    %94 = arith.addi %93, %88 : vector<8x128xi32>
    %c128_i32 = arith.constant 128 : i32
    %95 = vector.broadcast %c128_i32 : i32 to vector<8x128xi32>
    %96 = arith.muli %94, %95 : vector<8x128xi32>
    %97 = arith.addi %96, %89 : vector<8x128xi32>
    %c-1640531527_i32 = arith.constant -1640531527 : i32
    %98 = vector.broadcast %c-1640531527_i32 : i32 to vector<8x128xi32>
    %99 = arith.muli %97, %98 : vector<8x128xi32>
    %c-2048144789_i32 = arith.constant -2048144789 : i32
    %100 = arith.muli %87, %c-2048144789_i32 : i32
    %101 = vector.broadcast %100 : i32 to vector<8x128xi32>
    %102 = arith.addi %99, %101 : vector<8x128xi32>
    %c16_i32 = arith.constant 16 : i32
    %103 = vector.broadcast %c16_i32 : i32 to vector<8x128xi32>
    %104 = arith.shrui %102, %103 : vector<8x128xi32>
    %105 = arith.xori %102, %104 : vector<8x128xi32>
    %c2146121005_i32 = arith.constant 2146121005 : i32
    %106 = vector.broadcast %c2146121005_i32 : i32 to vector<8x128xi32>
    %107 = arith.muli %105, %106 : vector<8x128xi32>
    %c15_i32 = arith.constant 15 : i32
    %108 = vector.broadcast %c15_i32 : i32 to vector<8x128xi32>
    %109 = arith.shrui %107, %108 : vector<8x128xi32>
    %110 = arith.xori %107, %109 : vector<8x128xi32>
    %c-2073254261_i32 = arith.constant -2073254261 : i32
    %111 = vector.broadcast %c-2073254261_i32 : i32 to vector<8x128xi32>
    %112 = arith.muli %110, %111 : vector<8x128xi32>
    %c16_i32_90 = arith.constant 16 : i32
    %113 = vector.broadcast %c16_i32_90 : i32 to vector<8x128xi32>
    %114 = arith.shrui %112, %113 : vector<8x128xi32>
    %115 = arith.xori %112, %114 : vector<8x128xi32>
    %c31_i32 = arith.constant 31 : i32
    %116 = vector.broadcast %c31_i32 : i32 to vector<8x128xi32>
    %117 = arith.shrui %115, %116 : vector<8x128xi32>
    %c1_i32 = arith.constant 1 : i32
    %118 = vector.broadcast %c1_i32 : i32 to vector<8x128xi32>
    %119 = arith.cmpi eq, %117, %118 : vector<8x128xi32>
    %cst_91 = arith.constant 2.000000e+00 : f32
    %120 = vector.broadcast %cst_91 : f32 to vector<8x128xf32>
    %121 = arith.mulf %81, %120 : vector<8x128xf32>
    %cst_92 = arith.constant 0.000000e+00 : f32
    %122 = vector.broadcast %cst_92 : f32 to vector<8x128xf32>
    %123 = arith.select %119, %121, %122 : vector<8x128xi1>, vector<8x128xf32>
    %c0_93 = arith.constant 0 : index
    %c0_94 = arith.constant 0 : index
    %c0_95 = arith.constant 0 : index
    %c0_96 = arith.constant 0 : index
    %124 = vector.load %arg7[%c0_93, %c0_94, %c0_95, %c0_96] : memref<1x2x8x128xf32, #tpu.memory_space<vmem>>, vector<1x1x8x128xf32>
    %125 = vector.shape_cast %124 : vector<1x1x8x128xf32> to vector<8x128xf32>
    %126 = vector.shape_cast %123 : vector<8x128xf32> to vector<1x1x8x128xf32>
    tpu.vector_store %arg7[%c0_93, %c0_94, %c0_95, %c0_96], %126 {strides = array<i32>} : memref<1x2x8x128xf32, #tpu.memory_space<vmem>>, vector<1x1x8x128xf32>,
    %127 = tpu.iota {dimensions = array<i32: 0>} : vector<8x128xi32>
    %128 = tpu.iota {dimensions = array<i32: 1>} : vector<8x128xi32>
    %c2_i32_97 = arith.constant 2 : i32
    %129 = arith.muli %arg0, %c2_i32_97 : i32
    %c1_i32_98 = arith.constant 1 : i32
    %130 = arith.addi %129, %c1_i32_98 : i32
    %c8_i32_99 = arith.constant 8 : i32
    %131 = arith.muli %130, %c8_i32_99 : i32
    %132 = vector.broadcast %131 : i32 to vector<8x128xi32>
    %133 = arith.addi %132, %127 : vector<8x128xi32>
    %c128_i32_100 = arith.constant 128 : i32
    %134 = vector.broadcast %c128_i32_100 : i32 to vector<8x128xi32>
    %135 = arith.muli %133, %134 : vector<8x128xi32>
    %136 = arith.addi %135, %128 : vector<8x128xi32>
    %c-1640531527_i32_101 = arith.constant -1640531527 : i32
    %137 = vector.broadcast %c-1640531527_i32_101 : i32 to vector<8x128xi32>
    %138 = arith.muli %136, %137 : vector<8x128xi32>
    %c-2048144789_i32_102 = arith.constant -2048144789 : i32
    %139 = arith.muli %87, %c-2048144789_i32_102 : i32
    %140 = vector.broadcast %139 : i32 to vector<8x128xi32>
    %141 = arith.addi %138, %140 : vector<8x128xi32>
    %c16_i32_103 = arith.constant 16 : i32
    %142 = vector.broadcast %c16_i32_103 : i32 to vector<8x128xi32>
    %143 = arith.shrui %141, %142 : vector<8x128xi32>
    %144 = arith.xori %141, %143 : vector<8x128xi32>
    %c2146121005_i32_104 = arith.constant 2146121005 : i32
    %145 = vector.broadcast %c2146121005_i32_104 : i32 to vector<8x128xi32>
    %146 = arith.muli %144, %145 : vector<8x128xi32>
    %c15_i32_105 = arith.constant 15 : i32
    %147 = vector.broadcast %c15_i32_105 : i32 to vector<8x128xi32>
    %148 = arith.shrui %146, %147 : vector<8x128xi32>
    %149 = arith.xori %146, %148 : vector<8x128xi32>
    %c-2073254261_i32_106 = arith.constant -2073254261 : i32
    %150 = vector.broadcast %c-2073254261_i32_106 : i32 to vector<8x128xi32>
    %151 = arith.muli %149, %150 : vector<8x128xi32>
    %c16_i32_107 = arith.constant 16 : i32
    %152 = vector.broadcast %c16_i32_107 : i32 to vector<8x128xi32>
    %153 = arith.shrui %151, %152 : vector<8x128xi32>
    %154 = arith.xori %151, %153 : vector<8x128xi32>
    %c31_i32_108 = arith.constant 31 : i32
    %155 = vector.broadcast %c31_i32_108 : i32 to vector<8x128xi32>
    %156 = arith.shrui %154, %155 : vector<8x128xi32>
    %c1_i32_109 = arith.constant 1 : i32
    %157 = vector.broadcast %c1_i32_109 : i32 to vector<8x128xi32>
    %158 = arith.cmpi eq, %156, %157 : vector<8x128xi32>
    %cst_110 = arith.constant 2.000000e+00 : f32
    %159 = vector.broadcast %cst_110 : f32 to vector<8x128xf32>
    %160 = arith.mulf %86, %159 : vector<8x128xf32>
    %cst_111 = arith.constant 0.000000e+00 : f32
    %161 = vector.broadcast %cst_111 : f32 to vector<8x128xf32>
    %162 = arith.select %158, %160, %161 : vector<8x128xi1>, vector<8x128xf32>
    %c0_112 = arith.constant 0 : index
    %c1_113 = arith.constant 1 : index
    %c0_114 = arith.constant 0 : index
    %c0_115 = arith.constant 0 : index
    %163 = vector.load %arg7[%c0_112, %c1_113, %c0_114, %c0_115] : memref<1x2x8x128xf32, #tpu.memory_space<vmem>>, vector<1x1x8x128xf32>
    %164 = vector.shape_cast %163 : vector<1x1x8x128xf32> to vector<8x128xf32>
    %165 = vector.shape_cast %162 : vector<8x128xf32> to vector<1x1x8x128xf32>
    tpu.vector_store %arg7[%c0_112, %c1_113, %c0_114, %c0_115], %165 {strides = array<i32>} : memref<1x2x8x128xf32, #tpu.memory_space<vmem>>, vector<1x1x8x128xf32>,
    return
  }
  func.func @transform_0(%arg0: i32) -> i32 {
    %c0_i32 = arith.constant 0 : i32
    %c0_i32_0 = arith.constant 0 : i32
    return %c0_i32 : i32
  }
  func.func @transform_1(%arg0: i32) -> (i32, i32, i32) {
    %c0_i32 = arith.constant 0 : i32
    %c0_i32_0 = arith.constant 0 : i32
    %c0_i32_1 = arith.constant 0 : i32
    return %arg0, %c0_i32, %c0_i32_0 : i32, i32, i32
  }
  func.func @transform_2(%arg0: i32) -> (i32, i32) {
    %c0_i32 = arith.constant 0 : i32
    %c0_i32_0 = arith.constant 0 : i32
    %c0_i32_1 = arith.constant 0 : i32
    return %c0_i32, %c0_i32_0 : i32, i32
  }
  func.func @transform_3(%arg0: i32) -> (i32, i32) {
    %c0_i32 = arith.constant 0 : i32
    %c0_i32_0 = arith.constant 0 : i32
    %c0_i32_1 = arith.constant 0 : i32
    return %c0_i32, %c0_i32_0 : i32, i32
  }
  func.func @transform_4(%arg0: i32) -> (i32, i32, i32) {
    %c0_i32 = arith.constant 0 : i32
    %c0_i32_0 = arith.constant 0 : i32
    %c0_i32_1 = arith.constant 0 : i32
    %c0_i32_2 = arith.constant 0 : i32
    return %c0_i32, %c0_i32_0, %c0_i32_1 : i32, i32, i32
  }
  func.func @transform_5(%arg0: i32) -> (i32, i32) {
    %c0_i32 = arith.constant 0 : i32
    %c0_i32_0 = arith.constant 0 : i32
    %c0_i32_1 = arith.constant 0 : i32
    return %c0_i32, %c0_i32_0 : i32, i32
  }
  func.func @transform_6(%arg0: i32) -> (i32, i32, i32, i32) {
    %c0_i32 = arith.constant 0 : i32
    %c0_i32_0 = arith.constant 0 : i32
    %c0_i32_1 = arith.constant 0 : i32
    %c0_i32_2 = arith.constant 0 : i32
    return %arg0, %c0_i32, %c0_i32_0, %c0_i32_1 : i32, i32, i32, i32
  }
}

</mosaic_0001>

<bundles_post_ra>
// kernel: tile.13
= control target key start
LH: loop header
LB: loop body
LE: loop exit
PB: predicated region body
PF: predicated region fallthrough
CT: control target
= control target key end

     0   :  { %s40_s0 = inlined_call_operand.vmem [shape: f32[8], index: 0, kind: input, shape index: {}]   ;;  %s41_s1 = inlined_call_operand.vmem [shape: f32[32,8], index: 1, kind: output, shape index: {}]  }
   0x1   :  { %v4_v0 = vld [vmem:[%s40_s0] ss:$0 sm:$0xff] }
   0x2   :  { %5 = vst [vmem:[%s41_s1] sm:$0xff] %v4_v0  ;;  %12 = vst [vmem:[%s41_s1 + $0x8] sm:$0xff] %v4_v0 }
   0x3   :  { %13 = vst [vmem:[%s41_s1 + $0x10] sm:$0xff] %v4_v0  ;;  %14 = vst [vmem:[%s41_s1 + $0x18] sm:$0xff] %v4_v0 }

// kernel: tile.14
= control target key start
LH: loop header
LB: loop body
LE: loop exit
PB: predicated region body
PF: predicated region fallthrough
CT: control target
= control target key end

     0   :  { %s7_s6 = smov 3  ;;  %s21_s9 = smov 3  ;;  %vm4_vm0 = vcmask 64512   ;;  %vm11_vm1 = vcmask 1048512   ;;  %vm18_vm2 = vcmask 982912   ;;  %vm25_vm3 = vcmask 917312   ;;  %s235_s0 = inlined_call_operand.vmem [shape: f32[32,8], index: 0, kind: input, shape index: {}]   ;;  %s236_s1 = inlined_call_operand.vmem [shape: f32[1,256], index: 1, kind: output, shape index: {}]  }
   0x1   :  { %v125_v0 = vld [vmem:[%s235_s0 + $0xf] ss:$16 sm:%s7_s6]   ;;  %s156_s10 = smov 120   ;;  %v127_v1 = vld [vmem:[%s235_s0 + $0xd] ss:$16 sm:%s21_s9]   ;;  %s14_s13 = smov 3 }
   0x2   :  { %9 = vrot.lane.b32.xlu0 %v125_v0, %s156_s10  ;;  %s157_s14 = smov 104   ;;  %v126_v2 = vld [vmem:[%s235_s0 + $0xe] ss:$16 sm:%s14_s13]   ;;  %s28_s17 = smov 3  ;;  %vm32_vm4 = vcmask 851712   ;;  %vm39_vm5 = vcmask 786112  }
   0x3   :  { %23 = vrot.lane.b32.xlu1 %v127_v1, %s157_s14  ;;  %v128_v3 = vld [vmem:[%s235_s0 + $0xc] ss:$16 sm:%s28_s17]   ;;  %s35_s20 = smov 3  ;;  %s42_s21 = smov 3  ;;  %vm46_vm6 = vcmask 720512   ;;  %vm53_vm7 = vcmask 654912  }
   0x4   :  { %s158_s22 = smov 112   ;;  %s159_s23 = smov 96   ;;  %v129_v4 = vld [vmem:[%s235_s0 + $0xb] ss:$16 sm:%s35_s20]   ;;  %v130_v5 = vld [vmem:[%s235_s0 + $0xa] ss:$16 sm:%s42_s21]  }
   0x5   :  { %s49_s28 = smov 3  ;;  %s56_s29 = smov 3  ;;  %vm60_vm8 = vcmask 589312   ;;  %vm67_vm9 = vcmask 523712   ;;  %vm74_vm10 = vcmask 458112   ;;  %vm81_vm11 = vcmask 392512  }
   0x6   :  { %16 = vrot.lane.b32.xlu0 %v126_v2, %s158_s22  ;;  %s160_s30 = smov 88   ;;  %s161_s2 = smov 80   ;;  %v131_v6 = vld [vmem:[%s235_s0 + $0x9] ss:$16 sm:%s49_s28]   ;;  %vm88_vm12 = vcmask 326912   ;;  %vm95_vm13 = vcmask 261312  }
   0x7   :  { %30 = vrot.lane.b32.xlu1 %v128_v3, %s159_s23  ;;  %v132_v7 = vld [vmem:[%s235_s0 + $0x8] ss:$16 sm:%s56_s29]   ;;  %s63_s7 = smov 3  ;;  %s70_s8 = smov 3  ;;  %vm102_vm14 = vcmask 195712   ;;  %vm109_vm15 = vcmask 130112  }
   0x8   :  { %s162_s9 = smov 72   ;;  %s163_s10 = smov 64   ;;  %v133_v8 = vld [vmem:[%s235_s0 + $0x7] ss:$16 sm:%s63_s7]   ;;  %v134_v9 = vld [vmem:[%s235_s0 + $0x6] ss:$16 sm:%s70_s8]  }
   0x9   :  { %s2_s13 = smov 3  ;;  %s77_s16 = smov 3 }
   0xa   :  { %37 = vrot.lane.b32.xlu0 %v129_v4, %s160_s30  ;;  %v3_v10 = vld [vmem:[%s235_s0] ss:$16 sm:%s2_s13]   ;;  %s84_s19 = smov 3  ;;  %s164_s20 = smov 56  }
   0xb   :  { %44 = vrot.lane.b32.xlu1 %v130_v5, %s161_s2  ;;  %5 = vst.msk [vmem:[#allocation0] ss:$8 sm:$0x3] %vm4_vm0, %v3_v10   ;;  %s165_s21 = smov 48   ;;  %v135_v11 = vld [vmem:[%s235_s0 + $0x5] ss:$16 sm:%s77_s16]  }
   0xc   :  { %v136_v12 = vld [vmem:[%s235_s0 + $0x4] ss:$16 sm:%s84_s19]   ;;  %s91_s26 = smov 3  ;;  %s98_s27 = smov 3 }
   0xd   :  { %s166_s28 = smov 40   ;;  %s167_s29 = smov 32   ;;  %v137_v13 = vld [vmem:[%s235_s0 + $0x3] ss:$16 sm:%s91_s26]   ;;  %v138_v14 = vld [vmem:[%s235_s0 + $0x2] ss:$16 sm:%s98_s27]  }
   0xe   :  { %51 = vrot.lane.b32.xlu0 %v131_v6, %s162_s9  ;;  %s105_s5 = smov 3  ;;  %s168_s6 = smov 24  }
   0xf   :  { %58 = vrot.lane.b32.xlu1 %v132_v7, %s163_s10  ;;  %s169_s7 = smov 16   ;;  %v139_v15 = vld [vmem:[%s235_s0 + $0x1] ss:$16 sm:%s105_s5]   ;;  %s170_s0 = smov 8  }
  0x12   :  { %65 = vrot.lane.b32.xlu0 %v133_v8, %s164_s20 }
  0x13   :  { %72 = vrot.lane.b32.xlu1 %v134_v9, %s165_s21 }
  0x16   :  { %79 = vrot.lane.b32.xlu0 %v135_v11, %s166_s28 }
  0x17   :  { %86 = vrot.lane.b32.xlu1 %v136_v12, %s167_s29 }
  0x1a   :  { %93 = vrot.lane.b32.xlu0 %v137_v13, %s168_s6 }
  0x1b   :  { %100 = vrot.lane.b32.xlu1 %v138_v14, %s169_s7 }
  0x1e   :  { %107 = vrot.lane.b32.xlu0 %v139_v15, %s170_s0 }
  0x74   :  { %v10_v16 = vpop.permute.xlu0 %9  }
  0x75   :  { %12 = vst.msk [vmem:[#allocation0] ss:$8 sm:$0x3] %vm11_vm1, %v10_v16   ;;  %v24_v17 = vpop.permute.xlu1 %23  }
  0x78   :  { %v17_v18 = vpop.permute.xlu0 %16  }
  0x79   :  { %19 = vst.msk [vmem:[#allocation0] ss:$8 sm:$0x3] %vm18_vm2, %v17_v18   ;;  %v31_v19 = vpop.permute.xlu1 %30  }
  0x7a   :  { %26 = vst.msk [vmem:[#allocation0] ss:$8 sm:$0x3] %vm25_vm3, %v24_v17  }
  0x7b   :  { %33 = vst.msk [vmem:[#allocation0] ss:$8 sm:$0x3] %vm32_vm4, %v31_v19  }
  0x7c   :  { %v38_v20 = vpop.permute.xlu0 %37  }
  0x7d   :  { %40 = vst.msk [vmem:[#allocation0] ss:$8 sm:$0x3] %vm39_vm5, %v38_v20   ;;  %v45_v21 = vpop.permute.xlu1 %44  }
  0x7e   :  { %47 = vst.msk [vmem:[#allocation0] ss:$8 sm:$0x3] %vm46_vm6, %v45_v21  }
  0x80   :  { %v52_v22 = vpop.permute.xlu0 %51  }
  0x81   :  { %54 = vst.msk [vmem:[#allocation0] ss:$8 sm:$0x3] %vm53_vm7, %v52_v22   ;;  %v59_v23 = vpop.permute.xlu1 %58  }
  0x82   :  { %61 = vst.msk [vmem:[#allocation0] ss:$8 sm:$0x3] %vm60_vm8, %v59_v23  }
  0x84   :  { %v66_v24 = vpop.permute.xlu0 %65  }
  0x85   :  { %68 = vst.msk [vmem:[#allocation0] ss:$8 sm:$0x3] %vm67_vm9, %v66_v24   ;;  %v73_v25 = vpop.permute.xlu1 %72  }
  0x86   :  { %75 = vst.msk [vmem:[#allocation0] ss:$8 sm:$0x3] %vm74_vm10, %v73_v25  }
  0x88   :  { %v80_v26 = vpop.permute.xlu0 %79  }
  0x89   :  { %82 = vst.msk [vmem:[#allocation0] ss:$8 sm:$0x3] %vm81_vm11, %v80_v26   ;;  %v87_v27 = vpop.permute.xlu1 %86  }
  0x8a   :  { %89 = vst.msk [vmem:[#allocation0] ss:$8 sm:$0x3] %vm88_vm12, %v87_v27  }
  0x8c   :  { %v94_v28 = vpop.permute.xlu0 %93  }
  0x8d   :  { %96 = vst.msk [vmem:[#allocation0] ss:$8 sm:$0x3] %vm95_vm13, %v94_v28   ;;  %v101_v29 = vpop.permute.xlu1 %100  }
  0x8e   :  { %103 = vst.msk [vmem:[#allocation0] ss:$8 sm:$0x3] %vm102_vm14, %v101_v29  }
  0x90   :  { %v108_v30 = vpop.permute.xlu0 %107  }
  0x91   :  { %110 = vst.msk [vmem:[#allocation0] ss:$8 sm:$0x3] %vm109_vm15, %v108_v30  }
  0x98   :  { %v115_v31 = vld [vmem:[#allocation0] sm:$0x1]  ;;  %v120_v32 = vld [vmem:[#allocation0 + $0x8] sm:$0x1] }
  0x99   :  { %118 = vst [vmem:[%s236_s1] sm:$0x1] %v115_v31  ;;  %140 = vst [vmem:[%s236_s1 + $0x1] sm:$0x1] %v120_v32 }

// kernel: tile.18
= control target key start
LH: loop header
LB: loop body
LE: loop exit
PB: predicated region body
PF: predicated region fallthrough
CT: control target
= control target key end

     0   :  { %s28_s0 = inlined_call_operand.vmem [shape: f32[8], index: 0, kind: input, shape index: {}]   ;;  %s29_s1 = inlined_call_operand.vmem [shape: f32[16,8], index: 1, kind: output, shape index: {}]  }
   0x1   :  { %v4_v0 = vld [vmem:[%s28_s0] ss:$0 sm:$0xff] }
   0x2   :  { %5 = vst [vmem:[%s29_s1] sm:$0xff] %v4_v0  ;;  %8 = vst [vmem:[%s29_s1 + $0x8] sm:$0xff] %v4_v0 }

// kernel: tile.19
= control target key start
LH: loop header
LB: loop body
LE: loop exit
PB: predicated region body
PF: predicated region fallthrough
CT: control target
= control target key end

     0   :  { %s133_s10 = smov 120   ;;  %s134_s11 = smov 104   ;;  %vm3_vm0 = vcmask 64512   ;;  %vm9_vm1 = vcmask 1048512   ;;  %vm15_vm2 = vcmask 982912   ;;  %vm21_vm3 = vcmask 917312   ;;  %s209_s0 = inlined_call_operand.vmem [shape: f32[16,8], index: 0, kind: input, shape index: {}]   ;;  %s210_s1 = inlined_call_operand.vmem [shape: f32[1,128], index: 1, kind: output, shape index: {}]  }
   0x1   :  { %v103_v0 = vld [vmem:[%s209_s0 + $0xf] sm:$0x1]   ;;  %v105_v1 = vld [vmem:[%s209_s0 + $0xd] sm:$0x1]   ;;  %v104_v2 = vld [vmem:[%s209_s0 + $0xe] sm:$0x1]  }
   0x2   :  { %7 = vrot.lane.b32.xlu0 %v103_v0, %s133_s10  ;;  %19 = vrot.lane.b32.xlu1 %v105_v1, %s134_s11  ;;  %v106_v3 = vld [vmem:[%s209_s0 + $0xc] sm:$0x1]   ;;  %s135_s16 = smov 112   ;;  %s136_s17 = smov 96   ;;  %v107_v4 = vld [vmem:[%s209_s0 + $0xb] sm:$0x1]  }
   0x3   :  { %v108_v5 = vld [vmem:[%s209_s0 + $0xa] sm:$0x1]   ;;  %v2_v6 = vld [vmem:[%s209_s0] sm:$0x1]   ;;  %s137_s24 = smov 88   ;;  %s138_s25 = smov 80  }
   0x4   :  { %4 = vst.msk [vmem:[#allocation0] sm:$0x1] %vm3_vm0, %v2_v6   ;;  %v109_v7 = vld [vmem:[%s209_s0 + $0x9] sm:$0x1]   ;;  %v110_v8 = vld [vmem:[%s209_s0 + $0x8] sm:$0x1]  }
   0x5   :  { %s139_s30 = smov 72   ;;  %s140_s2 = smov 64   ;;  %v111_v9 = vld [vmem:[%s209_s0 + $0x7] sm:$0x1]   ;;  %v112_v10 = vld [vmem:[%s209_s0 + $0x6] sm:$0x1]  }
   0x6   :  { %13 = vrot.lane.b32.xlu0 %v104_v2, %s135_s16  ;;  %25 = vrot.lane.b32.xlu1 %v106_v3, %s136_s17  ;;  %s141_s7 = smov 56   ;;  %s142_s8 = smov 48   ;;  %v113_v11 = vld [vmem:[%s209_s0 + $0x5] sm:$0x1]   ;;  %v114_v12 = vld [vmem:[%s209_s0 + $0x4] sm:$0x1]  }
   0x7   :  { %s143_s13 = smov 40   ;;  %s144_s14 = smov 32   ;;  %v115_v13 = vld [vmem:[%s209_s0 + $0x3] sm:$0x1]   ;;  %v116_v14 = vld [vmem:[%s209_s0 + $0x2] sm:$0x1]  }
   0x8   :  { %s145_s19 = smov 24   ;;  %s146_s20 = smov 16   ;;  %v117_v15 = vld [vmem:[%s209_s0 + $0x1] sm:$0x1]   ;;  %vm27_vm4 = vcmask 851712   ;;  %vm33_vm5 = vcmask 786112  }
   0x9   :  { %s147_s0 = smov 8   ;;  %vm39_vm6 = vcmask 720512   ;;  %vm45_vm7 = vcmask 654912   ;;  %vm51_vm8 = vcmask 589312   ;;  %vm57_vm9 = vcmask 523712  }
   0xa   :  { %31 = vrot.lane.b32.xlu0 %v107_v4, %s137_s24  ;;  %37 = vrot.lane.b32.xlu1 %v108_v5, %s138_s25  ;;  %vm63_vm10 = vcmask 458112   ;;  %vm69_vm11 = vcmask 392512   ;;  %vm75_vm12 = vcmask 326912   ;;  %vm81_vm13 = vcmask 261312  }
   0xb   :  { %vm87_vm14 = vcmask 195712   ;;  %vm93_vm15 = vcmask 130112  }
   0xe   :  { %43 = vrot.lane.b32.xlu0 %v109_v7, %s139_s30  ;;  %49 = vrot.lane.b32.xlu1 %v110_v8, %s140_s2 }
  0x12   :  { %55 = vrot.lane.b32.xlu0 %v111_v9, %s141_s7  ;;  %61 = vrot.lane.b32.xlu1 %v112_v10, %s142_s8 }
  0x16   :  { %67 = vrot.lane.b32.xlu0 %v113_v11, %s143_s13  ;;  %73 = vrot.lane.b32.xlu1 %v114_v12, %s144_s14 }
  0x1a   :  { %79 = vrot.lane.b32.xlu0 %v115_v13, %s145_s19  ;;  %85 = vrot.lane.b32.xlu1 %v116_v14, %s146_s20 }
  0x1e   :  { %91 = vrot.lane.b32.xlu0 %v117_v15, %s147_s0 }
  0x74   :  { %v8_v16 = vpop.permute.xlu0 %7   ;;  %v20_v17 = vpop.permute.xlu1 %19  }
  0x75   :  { %10 = vst.msk [vmem:[#allocation0] sm:$0x1] %vm9_vm1, %v8_v16  }
  0x78   :  { %v14_v18 = vpop.permute.xlu0 %13   ;;  %v26_v19 = vpop.permute.xlu1 %25  }
  0x79   :  { %16 = vst.msk [vmem:[#allocation0] sm:$0x1] %vm15_vm2, %v14_v18  }
  0x7a   :  { %22 = vst.msk [vmem:[#allocation0] sm:$0x1] %vm21_vm3, %v20_v17  }
  0x7b   :  { %28 = vst.msk [vmem:[#allocation0] sm:$0x1] %vm27_vm4, %v26_v19  }
  0x7c   :  { %v32_v20 = vpop.permute.xlu0 %31   ;;  %v38_v21 = vpop.permute.xlu1 %37  }
  0x7d   :  { %34 = vst.msk [vmem:[#allocation0] sm:$0x1] %vm33_vm5, %v32_v20  }
  0x7e   :  { %40 = vst.msk [vmem:[#allocation0] sm:$0x1] %vm39_vm6, %v38_v21  }
  0x80   :  { %v44_v22 = vpop.permute.xlu0 %43   ;;  %v50_v23 = vpop.permute.xlu1 %49  }
  0x81   :  { %46 = vst.msk [vmem:[#allocation0] sm:$0x1] %vm45_vm7, %v44_v22  }
  0x82   :  { %52 = vst.msk [vmem:[#allocation0] sm:$0x1] %vm51_vm8, %v50_v23  }
  0x84   :  { %v56_v24 = vpop.permute.xlu0 %55   ;;  %v62_v25 = vpop.permute.xlu1 %61  }
  0x85   :  { %58 = vst.msk [vmem:[#allocation0] sm:$0x1] %vm57_vm9, %v56_v24  }
  0x86   :  { %64 = vst.msk [vmem:[#allocation0] sm:$0x1] %vm63_vm10, %v62_v25  }
  0x88   :  { %v68_v26 = vpop.permute.xlu0 %67   ;;  %v74_v27 = vpop.permute.xlu1 %73  }
  0x89   :  { %70 = vst.msk [vmem:[#allocation0] sm:$0x1] %vm69_vm11, %v68_v26  }
  0x8a   :  { %76 = vst.msk [vmem:[#allocation0] sm:$0x1] %vm75_vm12, %v74_v27  }
  0x8c   :  { %v80_v28 = vpop.permute.xlu0 %79   ;;  %v86_v29 = vpop.permute.xlu1 %85  }
  0x8d   :  { %82 = vst.msk [vmem:[#allocation0] sm:$0x1] %vm81_vm13, %v80_v28  }
  0x8e   :  { %88 = vst.msk [vmem:[#allocation0] sm:$0x1] %vm87_vm14, %v86_v29  }
  0x90   :  { %v92_v30 = vpop.permute.xlu0 %91  }
  0x91   :  { %94 = vst.msk [vmem:[#allocation0] sm:$0x1] %vm93_vm15, %v92_v30  }
  0x98   :  { %v99_v31 = vld [vmem:[#allocation0] sm:$0x1] }
  0x99   :  { %102 = vst [vmem:[%s210_s1] sm:$0x1] %v99_v31 }

// kernel: up_forward.1
= control target key start
LH: loop header
LB: loop body
LE: loop exit
PB: predicated region body
PF: predicated region fallthrough
CT: control target
= control target key end

     0   :  { %s1929_s23 = smov 0   ;;  %s2764_s0 = inlined_call_operand.<no memory space> [shape: s32[1], index: 0, kind: input, shape index: {}]   ;;  %s2765_s1 = inlined_call_operand.vmem [shape: f32[2,8,32], index: 1, kind: input, shape index: {}]   ;;  %s2766_s2 = inlined_call_operand.vmem [shape: f32[32,256], index: 2, kind: input, shape index: {}]   ;;  %s2767_s3 = inlined_call_operand.vmem [shape: f32[1,256], index: 3, kind: input, shape index: {}]   ;;  %s2768_s4 = inlined_call_operand.vmem [shape: f32[5,128,128], index: 4, kind: input, shape index: {}]   ;;  %s2769_s5 = inlined_call_operand.vmem [shape: f32[1,128], index: 5, kind: input, shape index: {}]   ;;  %s2770_s6 = inlined_call_operand.vmem [shape: f32[2,2,8,128], index: 6, kind: output, shape index: {}]  }
   0x1   :  { %11 = sst [smem:[#allocation3]] %s2764_s0 }
   0x2 LB: > { %s1935_s24 = sadd.s32 4294967295, %s1887_s23   ;;  %p1271_p0 = scmp.ge.s32.totalorder %s1887_s23, 1  ;;  %s1887_s23 = sphi %s1929_s23, %s17_s23  }
   0x3   : > { %p212_p1 = scmp.lt.s32.totalorder %s1887_s23, 3 }
   0x5   : > { %p213_p2 = pnand %p1271_p0, %p212_p1 }
   0x7   : > { %216 = sbr.rel (%p213_p2) target bundleno = 567 (0x237), region = 44 }
   0xc   : > { %v258_v0 = vld [vmem:[%s2766_s2 + $0x38] sm:$0xff]  ;;  %v257_v1 = vld [vmem:[%s2766_s2 + $0x30] sm:$0xff]  ;;  %v256_v2 = vld [vmem:[%s2766_s2 + $0x28] sm:$0xff]  ;;  %p241_p3 = scmp.lt.s32.totalorder %s1935_s24, 1  ;;  %v1889_v4 = vmov 0.0   ;;  %vm271_vm0 = vcmask 261120   ;;  %v2771_v42 = vlaneseq }
   0xd   : > { %299 = vmatprep.subr.mxu0 %v258_v0  ;;  %v255_v3 = vld [vmem:[%s2766_s2 + $0x20] sm:$0xff]  ;;  %339 = vmatprep.mubr.f32.mxu0 %v1889_v4  ;;  %348 = vst [vmem:[#allocation2] sm:$0xff] %v1889_v4  ;;  %349 = vst [vmem:[#allocation2 + $0x8] sm:$0x3] %v1889_v4  ;;  %v254_v5 = vld [vmem:[%s2766_s2 + $0x18] sm:$0xff]  ;;  %vm1890_vm1 = vmmov 0  }
   0xe   : > { %350 = vst [vmem:[#allocation2 + $0x10] sm:$0xff] %v1889_v4  ;;  %351 = vst [vmem:[#allocation2 + $0x18] sm:$0x3] %v1889_v4  ;;  %300 = vmatpush1.msra.mxu0 %v257_v1  ;;  %s1961_s10 = scalar_select %p241_p3, %s1935_s24, 1  ;;  %1521 = vmatprep.subr.mxu1 %v1889_v4  ;;  %v253_v6 = vld [vmem:[%s2766_s2 + $0x10] sm:$0xff]  ;;  %v1970_v7 = vld [vmem:[%s2768_s4 + $0xf8] sm:$0xff] }
   0xf   : > { %301 = vmatprep.subr.mxu0 %v256_v2  ;;  %v1975_v8 = vld [vmem:[%s2768_s4 + $0xf0] sm:$0xff]  ;;  %v252_v9 = vld [vmem:[%s2766_s2 + $0x8] sm:$0xff]  ;;  %1522 = vmatpush3.msra.mxu1 %v1970_v7  ;;  %v251_v10 = vld [vmem:[%s2766_s2] sm:$0xff]  ;;  %v2207_v43 = vshrl.u32 %v2771_v42, 7  ;;  %s1341_s30 = sshll.u32 %s1935_s24, 4  ;;  %s1162_s7 = sld [smem:[#allocation3]] }
  0x10   : > { %302 = vmatpush1.msra.mxu0 %v255_v3  ;;  %s1272_s19 = sshll.u32 %s1961_s10, 3  ;;  %1523 = vmatprep.subr.mxu1 %v1889_v4  ;;  %v1992_v11 = vld [vmem:[%s2768_s4 + $0xe8] sm:$0xff]  ;;  %v1998_v13 = vld [vmem:[%s2768_s4 + $0x78] sm:$0xff]  ;;  %v2005_v14 = vld [vmem:[%s2768_s4 + $0xe0] sm:$0xff]  ;;  %s1347_s12 = sshll.u32 %s1961_s10, 4 }
  0x11   : > { %303 = vmatprep.subr.mxu0 %v254_v5  ;;  %s244_s26 = scalar_lea.vmem %s2765_s1, %s1272_s19  ;;  %1524 = vmatpush3.msra.mxu1 %v1975_v8  ;;  %v2011_v15 = vld [vmem:[%s2768_s4 + $0x70] sm:$0xff]  ;;  %v2018_v16 = vld [vmem:[%s2768_s4 + $0xd8] sm:$0xff]  ;;  %v2024_v17 = vld [vmem:[%s2768_s4 + $0x68] sm:$0xff]  ;;  %2781 = vst [vmem:[#allocation4_spill] sm:$0xff] %v2207_v43  ;;  %v263_v44 = vsub.s32 0, %v2207_v43  ;;  %v267_v46 = vsub.s32 1, %v2207_v43  ;;  %s2754_s15 = scalar_lea.vmem %s2770_s6, %s1347_s12 }
  0x12   : > { %304 = vmatpush1.msra.mxu0 %v253_v6  ;;  %v250_v12 = vld [vmem:[%s244_s26] sm:$0xff]  ;;  %1525 = vmatprep.subr.mxu1 %v1889_v4  ;;  %v2032_v18 = vld [vmem:[%s2768_s4 + $0xd0] sm:$0xff]  ;;  %v2046_v20 = vld [vmem:[%s2768_s4 + $0xc8] sm:$0xff]  ;;  %s1349_s16 = sadd.s32 8, %s1341_s30 }
  0x13   : > { %305 = vmatprep.subr.mxu0 %v252_v9  ;;  %1526 = vmatpush3.msra.mxu1 %v1992_v11  ;;  %v2038_v19 = vld [vmem:[%s2768_s4 + $0x60] sm:$0xff]  ;;  %v2052_v21 = vld [vmem:[%s2768_s4 + $0x58] sm:$0xff]  ;;  %v2066_v23 = vld [vmem:[%s2768_s4 + $0x50] sm:$0xff] }
  0x14   : > { %306 = vmatpush1.msra.mxu0 %v251_v10  ;;  %1527 = vmatprep.subr.mxu1 %v1889_v4  ;;  %v2060_v22 = vld [vmem:[%s2768_s4 + $0xc0] sm:$0xff]  ;;  %v2074_v24 = vld [vmem:[%s2768_s4 + $0xb8] sm:$0xff]  ;;  %v2080_v25 = vld [vmem:[%s2768_s4 + $0x48] sm:$0xff] }
  0x15   : > { %1275 = vmatmul.mubr.msk.f32.vlgmr.msra.gmra.mxu0 %vm271_vm0, %v250_v12  ;;  %1556 = vmatprep.subr.mxu0 %v1889_v4  ;;  %v2089_v26 = vld [vmem:[%s2768_s4 + $0x40] sm:$0xff]  ;;  %v2098_v27 = vld [vmem:[%s2768_s4 + $0x38] sm:$0xff]  ;;  %v2105_v28 = vld [vmem:[%s2768_s4 + $0x30] sm:$0xff]  ;;  %s1173_s8 = smul.u32 2246822507, %s1162_s7 }
  0x16   : > { %1557 = vmatpush3.msra.mxu0 %v1998_v13  ;;  %1528 = vmatpush3.msra.mxu1 %v2005_v14  ;;  %v2114_v29 = vld [vmem:[%s2768_s4 + $0xb0] sm:$0xff]  ;;  %v2119_v30 = vld [vmem:[%s2768_s4 + $0x28] sm:$0xff]  ;;  %v2133_v32 = vld [vmem:[%s2768_s4 + $0x20] sm:$0xff] }
  0x17   : > { %1558 = vmatprep.subr.mxu0 %v1889_v4  ;;  %1529 = vmatprep.subr.mxu1 %v1889_v4  ;;  %v2128_v31 = vld [vmem:[%s2768_s4 + $0xa8] sm:$0xff]  ;;  %v2142_v33 = vld [vmem:[%s2768_s4 + $0xa0] sm:$0xff]  ;;  %v2147_v34 = vld [vmem:[%s2768_s4 + $0x18] sm:$0xff] }
  0x18   : > { %1559 = vmatpush3.msra.mxu0 %v2011_v15  ;;  %1530 = vmatpush3.msra.mxu1 %v2018_v16  ;;  %v2156_v35 = vld [vmem:[%s2768_s4 + $0x98] sm:$0xff]  ;;  %v2161_v36 = vld [vmem:[%s2768_s4 + $0x10] sm:$0xff]  ;;  %v2173_v38 = vld [vmem:[%s2768_s4 + $0x8] sm:$0xff] }
  0x19   : > { %1560 = vmatprep.subr.mxu0 %v1889_v4  ;;  %1531 = vmatprep.subr.mxu1 %v1889_v4  ;;  %v2168_v37 = vld [vmem:[%s2768_s4 + $0x90] sm:$0xff]  ;;  %v2180_v39 = vld [vmem:[%s2768_s4 + $0x88] sm:$0xff]  ;;  %v2185_v40 = vld [vmem:[%s2768_s4] sm:$0xff] }
  0x1a   : > { %1561 = vmatpush3.msra.mxu0 %v2024_v17  ;;  %1532 = vmatpush3.msra.mxu1 %v2032_v18  ;;  %v2194_v41 = vld [vmem:[%s2768_s4 + $0x80] sm:$0xff]  ;;  %v2223_v55 = vld [vmem:[%s2768_s4 + $0x1f8] sm:$0xff]  ;;  %v2233_v58 = vld [vmem:[%s2768_s4 + $0x1f0] sm:$0xff] }
  0x1b   : > { %1562 = vmatprep.subr.mxu0 %v1889_v4  ;;  %1533 = vmatprep.subr.mxu1 %v1889_v4  ;;  %v259_v45 = vld [vmem:[%s2767_s3] sm:$0x3]  ;;  %v2228_v57 = vld [vmem:[%s2768_s4 + $0x178] sm:$0xff]  ;;  %v2245_v60 = vld [vmem:[%s2768_s4 + $0x170] sm:$0xff] }
  0x1c   : > { %1563 = vmatpush3.msra.mxu0 %v2038_v19  ;;  %1534 = vmatpush3.msra.mxu1 %v2046_v20  ;;  %v264_v47 = vrot.slane %v259_v45, %v263_v44  ;;  %v268_v48 = vrot.slane %v259_v45, %v267_v46  ;;  %v2250_v61 = vld [vmem:[%s2768_s4 + $0x1e8] sm:$0xff]  ;;  %v2264_v63 = vld [vmem:[%s2768_s4 + $0x1e0] sm:$0xff]  ;;  %v2278_v1 = vld [vmem:[%s2768_s4 + $0x1d8] sm:$0xff] }
  0x1d   : > { %1564 = vmatprep.subr.mxu0 %v1889_v4  ;;  %1535 = vmatprep.subr.mxu1 %v1889_v4  ;;  %v2259_v62 = vld [vmem:[%s2768_s4 + $0x168] sm:$0xff]  ;;  %v2273_v0 = vld [vmem:[%s2768_s4 + $0x160] sm:$0xff]  ;;  %v2287_v2 = vld [vmem:[%s2768_s4 + $0x158] sm:$0xff] }
  0x1e   : > { %1565 = vmatpush3.msra.mxu0 %v2052_v21  ;;  %1536 = vmatpush3.msra.mxu1 %v2060_v22  ;;  %v2292_v3 = vld [vmem:[%s2768_s4 + $0x1d0] sm:$0xff]  ;;  %v2306_v6 = vld [vmem:[%s2768_s4 + $0x1c8] sm:$0xff]  ;;  %v2320_v10 = vld [vmem:[%s2768_s4 + $0x1c0] sm:$0xff] }
  0x1f   : > { %1566 = vmatprep.subr.mxu0 %v1889_v4  ;;  %1537 = vmatprep.subr.mxu1 %v1889_v4  ;;  %v2301_v5 = vld [vmem:[%s2768_s4 + $0x150] sm:$0xff]  ;;  %v2315_v9 = vld [vmem:[%s2768_s4 + $0x148] sm:$0xff]  ;;  %v2329_v12 = vld [vmem:[%s2768_s4 + $0x140] sm:$0xff] }
  0x20   : > { %1567 = vmatpush3.msra.mxu0 %v2066_v23  ;;  %1538 = vmatpush3.msra.mxu1 %v2074_v24  ;;  %v2334_v44 = vld [vmem:[%s2768_s4 + $0x1b8] sm:$0xff]  ;;  %v2348_v46 = vld [vmem:[%s2768_s4 + $0x1b0] sm:$0xff] }
  0x21   : > { %1568 = vmatprep.subr.mxu0 %v1889_v4  ;;  %1539 = vmatprep.subr.mxu1 %v1889_v4  ;;  %v2343_v45 = vld [vmem:[%s2768_s4 + $0x138] sm:$0xff]  ;;  %2782 = vst [vmem:[#allocation5_spill] sm:$0xff] %v2348_v46  ;;  %v2404_v42 = vld [vmem:[%s2768_s4 + $0x190] sm:$0xff] }
  0x22   : > { %1569 = vmatpush3.msra.mxu0 %v2080_v25  ;;  %1540 = vmatpush3.msra.mxu1 %v2114_v29  ;;  %2786 = vst [vmem:[#allocation9_spill] sm:$0xff] %v2404_v42  ;;  %v2413_v43 = vld [vmem:[%s2768_s4 + $0x110] sm:$0xff] }
  0x23   : > { %1570 = vmatprep.subr.mxu0 %v1889_v4  ;;  %1541 = vmatprep.subr.mxu1 %v1889_v4 }
  0x24   : > { %1571 = vmatpush3.msra.mxu0 %v2089_v26  ;;  %1542 = vmatpush3.msra.mxu1 %v2128_v31 }
  0x25   : > { %1572 = vmatprep.subr.mxu0 %v1889_v4  ;;  %1543 = vmatprep.subr.mxu1 %v1889_v4 }
  0x26   : > { %1573 = vmatpush3.msra.mxu0 %v2098_v27  ;;  %1544 = vmatpush3.msra.mxu1 %v2142_v33 }
  0x27   : > { %1574 = vmatprep.subr.mxu0 %v1889_v4  ;;  %1545 = vmatprep.subr.mxu1 %v1889_v4 }
  0x28   : > { %1575 = vmatpush3.msra.mxu0 %v2105_v28  ;;  %1546 = vmatpush3.msra.mxu1 %v2156_v35 }
  0x29   : > { %1576 = vmatprep.subr.mxu0 %v1889_v4  ;;  %1547 = vmatprep.subr.mxu1 %v1889_v4 }
  0x2a   : > { %1577 = vmatpush3.msra.mxu0 %v2119_v30  ;;  %1548 = vmatpush3.msra.mxu1 %v2168_v37 }
  0x2b   : > { %1578 = vmatprep.subr.mxu0 %v1889_v4  ;;  %1549 = vmatprep.subr.mxu1 %v1889_v4 }
  0x2c   : > { %1579 = vmatpush3.msra.mxu0 %v2133_v32  ;;  %1550 = vmatpush3.msra.mxu1 %v2180_v39 }
  0x2d   : > { %1580 = vmatprep.subr.mxu0 %v1889_v4  ;;  %1551 = vmatprep.subr.mxu1 %v1889_v4 }
  0x2e   : > { %1581 = vmatpush3.msra.mxu0 %v2147_v34  ;;  %1588 = vmatprep.mubr.msk.f32.mxu0 %vm1890_vm1, %v1889_v4 }
  0x2f   : > { %1582 = vmatprep.subr.mxu0 %v1889_v4  ;;  %1552 = vmatpush3.msra.mxu1 %v2194_v41 }
  0x30   : > { %1583 = vmatpush3.msra.mxu0 %v2161_v36  ;;  %1553 = vmatprep.mubr.msk.f32.mxu1 %vm1890_vm1, %v1889_v4 }
  0x31   : > { %1584 = vmatprep.subr.mxu0 %v1889_v4  ;;  %1591 = vmatprep.subr.mxu1 %v1889_v4 }
  0x32   : > { %1585 = vmatpush3.msra.mxu0 %v2173_v38 }
  0x33   : > { %1586 = vmatprep.subr.mxu0 %v1889_v4 }
  0x34   : > { %1587 = vmatpush3.msra.mxu0 %v2185_v40 }
  0x35   : > { %1626 = vmatprep.subr.mxu0 %v1889_v4 }
  0xd5   : > { %v341_v49 = vpop.f32.mrf.mxu0 }
  0xd6   : > { %v342_v50 = vadd.f32 %v341_v49, %v264_v47  ;;  %v2357_v47 = vld [vmem:[%s2768_s4 + $0x130] sm:$0xff]  ;;  %v2371_v49 = vld [vmem:[%s2768_s4 + $0x128] sm:$0xff] }
  0xd7   : > { %v343_v51 = vpop.f32.mrf.mxu0 }
  0xd8   : > { %v2214_v52 = vmax.f32 %v342_v50, 0.0  ;;  %v344_v53 = vadd.f32 %v343_v51, %v268_v48  ;;  %v2362_v48 = vld [vmem:[%s2768_s4 + $0x1a8] sm:$0xff]  ;;  %v2376_v50 = vld [vmem:[%s2768_s4 + $0x1a0] sm:$0xff] }
  0xd9   : > { %2783 = vst [vmem:[#allocation6_spill] sm:$0xff] %v2362_v48  ;;  %2784 = vst [vmem:[#allocation7_spill] sm:$0xff] %v2376_v50  ;;  %v2385_v51 = vld [vmem:[%s2768_s4 + $0x120] sm:$0xff] }
  0xda   : > { %352 = vst [vmem:[#allocation2 + $0x1] sm:$0xff] %v2214_v52  ;;  %v2217_v54 = vmax.f32 %v344_v53, 0.0  ;;  %v2390_v53 = vld [vmem:[%s2768_s4 + $0x198] sm:$0xff] }
  0xdb   : > { %2785 = vst [vmem:[#allocation8_spill] sm:$0xff] %v2390_v53 }
  0xdc   : > { %354 = vst [vmem:[#allocation2 + $0x11] sm:$0xff] %v2217_v54 }
  0xe1   : > { %v355_v56 = vld [vmem:[#allocation2] sm:$0xff] }
  0xe2   : > { %1589 = vmatmul.mubr.f32.vlgmr.msra.gmra.mxu0 %v355_v56  ;;  %v2399_v56 = vld [vmem:[%s2768_s4 + $0x118] sm:$0xff] }
  0xe3   : > { %1627 = vmatpush3.msra.mxu0 %v2223_v55  ;;  %v2236_v59 = vld [vmem:[#allocation2 + $0x10] sm:$0xff]  ;;  %1658 = vmatprep.mubr.msk.f32.mxu0 %vm1890_vm1, %v1889_v4 }
  0xe4   : > { %1628 = vmatprep.subr.mxu0 %v1889_v4  ;;  %1554 = vmatmul.mubr.f32.vlgmr.msra.gmra.mxu1 %v2236_v59 }
  0xe5   : > { %1592 = vmatpush3.msra.mxu1 %v2228_v57  ;;  %1629 = vmatpush3.msra.mxu0 %v2233_v58 }
  0xe6   : > { %1593 = vmatprep.subr.mxu1 %v1889_v4  ;;  %1630 = vmatprep.subr.mxu0 %v1889_v4 }
  0xe7   : > { %1594 = vmatpush3.msra.mxu1 %v2245_v60  ;;  %1631 = vmatpush3.msra.mxu0 %v2250_v61 }
  0xe8   : > { %1595 = vmatprep.subr.mxu1 %v1889_v4  ;;  %1632 = vmatprep.subr.mxu0 %v1889_v4 }
  0xe9   : > { %1596 = vmatpush3.msra.mxu1 %v2259_v62  ;;  %1633 = vmatpush3.msra.mxu0 %v2264_v63 }
  0xea   : > { %1597 = vmatprep.subr.mxu1 %v1889_v4  ;;  %1634 = vmatprep.subr.mxu0 %v1889_v4 }
  0xeb   : > { %1598 = vmatpush3.msra.mxu1 %v2273_v0  ;;  %1635 = vmatpush3.msra.mxu0 %v2278_v1 }
  0xec   : > { %1599 = vmatprep.subr.mxu1 %v1889_v4  ;;  %1636 = vmatprep.subr.mxu0 %v1889_v4 }
  0xed   : > { %1600 = vmatpush3.msra.mxu1 %v2287_v2  ;;  %1637 = vmatpush3.msra.mxu0 %v2292_v3 }
  0xee   : > { %1601 = vmatprep.subr.mxu1 %v1889_v4  ;;  %1638 = vmatprep.subr.mxu0 %v1889_v4 }
  0xef   : > { %1602 = vmatpush3.msra.mxu1 %v2301_v5  ;;  %1639 = vmatpush3.msra.mxu0 %v2306_v6 }
  0xf0   : > { %1603 = vmatprep.subr.mxu1 %v1889_v4  ;;  %1640 = vmatprep.subr.mxu0 %v1889_v4 }
  0xf1   : > { %1604 = vmatpush3.msra.mxu1 %v2315_v9  ;;  %1641 = vmatpush3.msra.mxu0 %v2320_v10 }
  0xf2   : > { %1605 = vmatprep.subr.mxu1 %v1889_v4  ;;  %1642 = vmatprep.subr.mxu0 %v1889_v4 }
  0xf3   : > { %1606 = vmatpush3.msra.mxu1 %v2329_v12  ;;  %1643 = vmatpush3.msra.mxu0 %v2334_v44 }
  0xf4   : > { %1607 = vmatprep.subr.mxu1 %v1889_v4  ;;  %1644 = vmatprep.subr.mxu0 %v1889_v4 }
  0xf5   : > { %1608 = vmatpush3.msra.mxu1 %v2343_v45  ;;  %1645 = vmatpush3.msra.mxu0 %v2348_v46  ;;  %v2480_v46 = vld [vmem:[%s2768_s4 + $0x260] sm:$0xff] }
  0xf6   : > { %1609 = vmatprep.subr.mxu1 %v1889_v4  ;;  %1646 = vmatprep.subr.mxu0 %v1889_v4 }
  0xf7   : > { %1610 = vmatpush3.msra.mxu1 %v2357_v47  ;;  %1647 = vmatpush3.msra.mxu0 %v2362_v48  ;;  %v2432_v48 = vld [vmem:[%s2768_s4 + $0x180] sm:$0xff] }
  0xf8   : > { %1611 = vmatprep.subr.mxu1 %v1889_v4  ;;  %1648 = vmatprep.subr.mxu0 %v1889_v4  ;;  %2788 = vst [vmem:[#allocation11_spill] sm:$0xff] %v2432_v48 }
  0xf9   : > { %1612 = vmatpush3.msra.mxu1 %v2371_v49  ;;  %1649 = vmatpush3.msra.mxu0 %v2376_v50  ;;  %v2418_v50 = vld [vmem:[%s2768_s4 + $0x188] sm:$0xff] }
  0xfa   : > { %1613 = vmatprep.subr.mxu1 %v1889_v4  ;;  %1650 = vmatprep.subr.mxu0 %v1889_v4  ;;  %2787 = vst [vmem:[#allocation10_spill] sm:$0xff] %v2418_v50 }
  0xfb   : > { %1614 = vmatpush3.msra.mxu1 %v2385_v51  ;;  %1651 = vmatpush3.msra.mxu0 %v2390_v53  ;;  %v2427_v53 = vld [vmem:[%s2768_s4 + $0x108] sm:$0xff] }
  0xfc   : > { %1615 = vmatprep.subr.mxu1 %v1889_v4  ;;  %1652 = vmatprep.subr.mxu0 %v1889_v4 }
  0xfd   : > { %1616 = vmatpush3.msra.mxu1 %v2399_v56  ;;  %1653 = vmatpush3.msra.mxu0 %v2404_v42  ;;  %v2441_v42 = vld [vmem:[%s2768_s4 + $0x100] sm:$0xff] }
  0xfe   : > { %1617 = vmatprep.subr.mxu1 %v1889_v4  ;;  %1654 = vmatprep.subr.mxu0 %v1889_v4 }
  0xff   : > { %1618 = vmatpush3.msra.mxu1 %v2413_v43  ;;  %1655 = vmatpush3.msra.mxu0 %v2418_v50  ;;  %v2452_v50 = vld [vmem:[%s2768_s4 + $0x278] sm:$0xff] }
 0x100   : > { %1619 = vmatprep.subr.mxu1 %v1889_v4  ;;  %1656 = vmatprep.subr.mxu0 %v1889_v4 }
 0x101   : > { %1620 = vmatpush3.msra.mxu1 %v2427_v53  ;;  %1657 = vmatpush3.msra.mxu0 %v2432_v48  ;;  %v2462_v48 = vld [vmem:[%s2768_s4 + $0x270] sm:$0xff] }
 0x102   : > { %1621 = vmatprep.subr.mxu1 %v1889_v4  ;;  %1659 = vmatmul.mubr.f32.vlgmr.msra.gmra.mxu0 %v2217_v54 }
 0x103   : > { %1696 = vmatprep.subr.mxu0 %v1889_v4  ;;  %1622 = vmatpush3.msra.mxu1 %v2441_v42 }
 0x104   : > { %1623 = vmatprep.mubr.msk.f32.mxu1 %vm1890_vm1, %v1889_v4  ;;  %1697 = vmatpush3.msra.mxu0 %v1970_v7  ;;  %v2471_v7 = vld [vmem:[%s2768_s4 + $0x268] sm:$0xff] }
 0x105   : > { %1624 = vmatmul.mubr.f32.vlgmr.msra.gmra.mxu1 %v2214_v52  ;;  %1661 = vmatprep.subr.mxu1 %v1889_v4 }
 0x106   : > { %1698 = vmatprep.subr.mxu0 %v1889_v4  ;;  %1662 = vmatpush3.msra.mxu1 %v2452_v50 }
 0x107   : > { %1699 = vmatpush3.msra.mxu0 %v1975_v8  ;;  %1663 = vmatprep.subr.mxu1 %v1889_v4  ;;  %v2489_v8 = vld [vmem:[%s2768_s4 + $0x258] sm:$0xff] }
 0x108   : > { %1700 = vmatprep.subr.mxu0 %v1889_v4  ;;  %1664 = vmatpush3.msra.mxu1 %v2462_v48 }
 0x109   : > { %1701 = vmatpush3.msra.mxu0 %v1992_v11  ;;  %1665 = vmatprep.subr.mxu1 %v1889_v4  ;;  %v2498_v11 = vld [vmem:[%s2768_s4 + $0x250] sm:$0xff] }
 0x10a   : > { %1702 = vmatprep.subr.mxu0 %v1889_v4  ;;  %1666 = vmatpush3.msra.mxu1 %v2471_v7 }
 0x10b   : > { %1703 = vmatpush3.msra.mxu0 %v2005_v14  ;;  %1667 = vmatprep.subr.mxu1 %v1889_v4  ;;  %v2507_v14 = vld [vmem:[%s2768_s4 + $0x248] sm:$0xff] }
 0x10c   : > { %1704 = vmatprep.subr.mxu0 %v1889_v4  ;;  %1668 = vmatpush3.msra.mxu1 %v2480_v46 }
 0x10d   : > { %1705 = vmatpush3.msra.mxu0 %v2018_v16  ;;  %1669 = vmatprep.subr.mxu1 %v1889_v4  ;;  %v2516_v16 = vld [vmem:[%s2768_s4 + $0x240] sm:$0xff] }
 0x10e   : > { %1706 = vmatprep.subr.mxu0 %v1889_v4  ;;  %1670 = vmatpush3.msra.mxu1 %v2489_v8 }
 0x10f   : > { %1707 = vmatpush3.msra.mxu0 %v2032_v18  ;;  %1671 = vmatprep.subr.mxu1 %v1889_v4  ;;  %v2525_v18 = vld [vmem:[%s2768_s4 + $0x238] sm:$0xff] }
 0x110   : > { %1708 = vmatprep.subr.mxu0 %v1889_v4  ;;  %1672 = vmatpush3.msra.mxu1 %v2498_v11 }
 0x111   : > { %1709 = vmatpush3.msra.mxu0 %v2046_v20  ;;  %1673 = vmatprep.subr.mxu1 %v1889_v4  ;;  %v2534_v20 = vld [vmem:[%s2768_s4 + $0x230] sm:$0xff] }
 0x112   : > { %1710 = vmatprep.subr.mxu0 %v1889_v4  ;;  %1674 = vmatpush3.msra.mxu1 %v2507_v14 }
 0x113   : > { %1711 = vmatpush3.msra.mxu0 %v2060_v22  ;;  %1675 = vmatprep.subr.mxu1 %v1889_v4  ;;  %v2543_v22 = vld [vmem:[%s2768_s4 + $0x228] sm:$0xff] }
 0x114   : > { %1712 = vmatprep.subr.mxu0 %v1889_v4  ;;  %1676 = vmatpush3.msra.mxu1 %v2516_v16 }
 0x115   : > { %1713 = vmatpush3.msra.mxu0 %v2074_v24  ;;  %1677 = vmatprep.subr.mxu1 %v1889_v4  ;;  %v2552_v24 = vld [vmem:[%s2768_s4 + $0x220] sm:$0xff] }
 0x116   : > { %1714 = vmatprep.subr.mxu0 %v1889_v4  ;;  %1678 = vmatpush3.msra.mxu1 %v2525_v18 }
 0x117   : > { %1715 = vmatpush3.msra.mxu0 %v2114_v29  ;;  %1679 = vmatprep.subr.mxu1 %v1889_v4  ;;  %v2561_v29 = vld [vmem:[%s2768_s4 + $0x218] sm:$0xff] }
 0x118   : > { %1716 = vmatprep.subr.mxu0 %v1889_v4  ;;  %1680 = vmatpush3.msra.mxu1 %v2534_v20 }
 0x119   : > { %1717 = vmatpush3.msra.mxu0 %v2128_v31  ;;  %1681 = vmatprep.subr.mxu1 %v1889_v4  ;;  %v2570_v31 = vld [vmem:[%s2768_s4 + $0x210] sm:$0xff] }
 0x11a   : > { %1718 = vmatprep.subr.mxu0 %v1889_v4  ;;  %1682 = vmatpush3.msra.mxu1 %v2543_v22 }
 0x11b   : > { %1719 = vmatpush3.msra.mxu0 %v2142_v33  ;;  %1683 = vmatprep.subr.mxu1 %v1889_v4  ;;  %v2579_v33 = vld [vmem:[%s2768_s4 + $0x208] sm:$0xff] }
 0x11c   : > { %1720 = vmatprep.subr.mxu0 %v1889_v4  ;;  %1684 = vmatpush3.msra.mxu1 %v2552_v24 }
 0x11d   : > { %1721 = vmatpush3.msra.mxu0 %v2156_v35  ;;  %1685 = vmatprep.subr.mxu1 %v1889_v4  ;;  %v2590_v35 = vld [vmem:[%s2768_s4 + $0x200] sm:$0xff] }
 0x11e   : > { %1722 = vmatprep.subr.mxu0 %v1889_v4  ;;  %1686 = vmatpush3.msra.mxu1 %v2561_v29 }
 0x11f   : > { %1723 = vmatpush3.msra.mxu0 %v2168_v37  ;;  %1687 = vmatprep.subr.mxu1 %v1889_v4  ;;  %v2602_v37 = vld [vmem:[#allocation2 + $0x2] sm:$0xff] }
 0x120   : > { %1724 = vmatprep.subr.mxu0 %v1889_v4  ;;  %1688 = vmatpush3.msra.mxu1 %v2570_v31 }
 0x121   : > { %1725 = vmatpush3.msra.mxu0 %v2180_v39  ;;  %1689 = vmatprep.subr.mxu1 %v1889_v4  ;;  %v2797_v39 = vlaneseq }
 0x122   : > { %1726 = vmatprep.subr.mxu0 %v1889_v4  ;;  %1690 = vmatpush3.msra.mxu1 %v2579_v33 }
 0x123   : > { %1727 = vmatpush3.msra.mxu0 %v2194_v41  ;;  %1728 = vmatprep.mubr.msk.f32.mxu0 %vm1890_vm1, %v1889_v4 }
 0x124   : > { %1691 = vmatprep.subr.mxu1 %v1889_v4  ;;  %1729 = vmatmul.mubr.f32.vlgmr.msra.gmra.mxu0 %v2214_v52 }
 0x125   : > { %1766 = vmatprep.subr.mxu0 %v1889_v4  ;;  %1692 = vmatpush3.msra.mxu1 %v2590_v35 }
 0x126   : > { %1693 = vmatprep.mubr.msk.f32.mxu1 %vm1890_vm1, %v1889_v4  ;;  %1767 = vmatpush3.msra.mxu0 %v2228_v57 }
 0x127   : > { %1694 = vmatmul.mubr.f32.vlgmr.msra.gmra.mxu1 %v2602_v37  ;;  %1731 = vmatprep.subr.mxu1 %v1889_v4 }
 0x128   : > { %1768 = vmatprep.subr.mxu0 %v1889_v4  ;;  %1732 = vmatpush3.msra.mxu1 %v1998_v13  ;;  %v2789_v13 = vld [vmem:[#allocation5_spill] sm:$0xff] }
 0x129   : > { %1769 = vmatpush3.msra.mxu0 %v2245_v60  ;;  %1733 = vmatprep.subr.mxu1 %v1889_v4 }
 0x12a   : > { %1770 = vmatprep.subr.mxu0 %v1889_v4  ;;  %1734 = vmatpush3.msra.mxu1 %v2011_v15  ;;  %v2790_v15 = vld [vmem:[#allocation6_spill] sm:$0xff] }
 0x12b   : > { %1771 = vmatpush3.msra.mxu0 %v2259_v62  ;;  %1735 = vmatprep.subr.mxu1 %v1889_v4 }
 0x12c   : > { %1772 = vmatprep.subr.mxu0 %v1889_v4  ;;  %1736 = vmatpush3.msra.mxu1 %v2024_v17  ;;  %v2791_v17 = vld [vmem:[#allocation7_spill] sm:$0xff] }
 0x12d   : > { %1773 = vmatpush3.msra.mxu0 %v2273_v0  ;;  %1737 = vmatprep.subr.mxu1 %v1889_v4 }
 0x12e   : > { %1774 = vmatprep.subr.mxu0 %v1889_v4  ;;  %1738 = vmatpush3.msra.mxu1 %v2038_v19  ;;  %v2792_v19 = vld [vmem:[#allocation8_spill] sm:$0xff] }
 0x12f   : > { %1775 = vmatpush3.msra.mxu0 %v2287_v2  ;;  %1739 = vmatprep.subr.mxu1 %v1889_v4 }
 0x130   : > { %1776 = vmatprep.subr.mxu0 %v1889_v4  ;;  %1740 = vmatpush3.msra.mxu1 %v2052_v21  ;;  %v2793_v21 = vld [vmem:[#allocation9_spill] sm:$0xff] }
 0x131   : > { %1777 = vmatpush3.msra.mxu0 %v2301_v5  ;;  %1741 = vmatprep.subr.mxu1 %v1889_v4 }
 0x132   : > { %1778 = vmatprep.subr.mxu0 %v1889_v4  ;;  %1742 = vmatpush3.msra.mxu1 %v2066_v23  ;;  %v2794_v23 = vld [vmem:[#allocation10_spill] sm:$0xff] }
 0x133   : > { %1779 = vmatpush3.msra.mxu0 %v2315_v9  ;;  %1743 = vmatprep.subr.mxu1 %v1889_v4 }
 0x134   : > { %1780 = vmatprep.subr.mxu0 %v1889_v4  ;;  %1744 = vmatpush3.msra.mxu1 %v2080_v25  ;;  %v1079_v25 = vld [vmem:[#allocation2 + $0x12] sm:$0xff] }
 0x135   : > { %1781 = vmatpush3.msra.mxu0 %v2329_v12  ;;  %1745 = vmatprep.subr.mxu1 %v1889_v4 }
 0x136   : > { %1782 = vmatprep.subr.mxu0 %v1889_v4  ;;  %1746 = vmatpush3.msra.mxu1 %v2089_v26  ;;  %v2795_v26 = vld [vmem:[#allocation11_spill] sm:$0xff] }
 0x137   : > { %1783 = vmatpush3.msra.mxu0 %v2343_v45  ;;  %1747 = vmatprep.subr.mxu1 %v1889_v4 }
 0x138   : > { %1784 = vmatprep.subr.mxu0 %v1889_v4  ;;  %1748 = vmatpush3.msra.mxu1 %v2098_v27 }
 0x139   : > { %1785 = vmatpush3.msra.mxu0 %v2357_v47  ;;  %1749 = vmatprep.subr.mxu1 %v1889_v4 }
 0x13a   : > { %1786 = vmatprep.subr.mxu0 %v1889_v4  ;;  %1750 = vmatpush3.msra.mxu1 %v2105_v28 }
 0x13b   : > { %1787 = vmatpush3.msra.mxu0 %v2371_v49  ;;  %1751 = vmatprep.subr.mxu1 %v1889_v4 }
 0x13c   : > { %1788 = vmatprep.subr.mxu0 %v1889_v4  ;;  %1752 = vmatpush3.msra.mxu1 %v2119_v30 }
 0x13d   : > { %1789 = vmatpush3.msra.mxu0 %v2385_v51  ;;  %1753 = vmatprep.subr.mxu1 %v1889_v4 }
 0x13e   : > { %1790 = vmatprep.subr.mxu0 %v1889_v4  ;;  %1754 = vmatpush3.msra.mxu1 %v2133_v32 }
 0x13f   : > { %1791 = vmatpush3.msra.mxu0 %v2399_v56  ;;  %1755 = vmatprep.subr.mxu1 %v1889_v4 }
 0x140   : > { %1792 = vmatprep.subr.mxu0 %v1889_v4  ;;  %1756 = vmatpush3.msra.mxu1 %v2147_v34  ;;  %v1168_v34 = vstv %s1341_s30 }
 0x141   : > { %1793 = vmatpush3.msra.mxu0 %v2413_v43  ;;  %1757 = vmatprep.subr.mxu1 %v1889_v4 }
 0x142   : > { %1794 = vmatprep.subr.mxu0 %v1889_v4  ;;  %1758 = vmatpush3.msra.mxu1 %v2161_v36  ;;  %v2796_v36 = vld [vmem:[#allocation4_spill] sm:$0xff] }
 0x143   : > { %1795 = vmatpush3.msra.mxu0 %v2427_v53  ;;  %1759 = vmatprep.subr.mxu1 %v1889_v4  ;;  %v1192_v53 = vstv %s1349_s16 }
 0x144   : > { %1796 = vmatprep.subr.mxu0 %v1889_v4  ;;  %1760 = vmatpush3.msra.mxu1 %v2173_v38  ;;  %v1169_v38 = vadd.s32 %v1168_v34, %v2796_v36  ;;  %v1193_v56 = vadd.s32 %v1192_v53, %v2796_v36 }
 0x145   : > { %1797 = vmatpush3.msra.mxu0 %v2441_v42  ;;  %1798 = vmatprep.mubr.msk.f32.mxu0 %vm1890_vm1, %v1889_v4 }
 0x146   : > { %1761 = vmatprep.subr.mxu1 %v1889_v4  ;;  %1799 = vmatmul.mubr.f32.vlgmr.msra.gmra.mxu0 %v2217_v54  ;;  %v1170_v41 = vmul.u32 128, %v1169_v38 }
 0x147   : > { %1836 = vmatprep.subr.mxu0 %v1889_v4  ;;  %1762 = vmatpush3.msra.mxu1 %v2185_v40  ;;  %v1166_v40 = vand.u32 127, %v2797_v39 }
 0x148   : > { %1763 = vmatprep.mubr.msk.f32.mxu1 %vm1890_vm1, %v1889_v4  ;;  %1837 = vmatpush3.msra.mxu0 %v2452_v50 }
 0x149   : > { %1764 = vmatmul.mubr.f32.vlgmr.msra.gmra.mxu1 %v2236_v59  ;;  %1801 = vmatprep.subr.mxu1 %v1889_v4  ;;  %v1171_v42 = vadd.s32 %v1170_v41, %v1166_v40 }
 0x14a   : > { %1838 = vmatprep.subr.mxu0 %v1889_v4  ;;  %1802 = vmatpush3.msra.mxu1 %v2223_v55 }
 0x14b   : > { %1839 = vmatpush3.msra.mxu0 %v2462_v48  ;;  %1803 = vmatprep.subr.mxu1 %v1889_v4  ;;  %v1172_v43 = vmul.u32 2654435769, %v1171_v42 }
 0x14c   : > { %1840 = vmatprep.subr.mxu0 %v1889_v4  ;;  %1804 = vmatpush3.msra.mxu1 %v2233_v58 }
 0x14d   : > { %1841 = vmatpush3.msra.mxu0 %v2471_v7  ;;  %1805 = vmatprep.subr.mxu1 %v1889_v4  ;;  %v1194_v7 = vmul.u32 128, %v1193_v56 }
 0x14e   : > { %1842 = vmatprep.subr.mxu0 %v1889_v4  ;;  %1806 = vmatpush3.msra.mxu1 %v2250_v61 }
 0x14f   : > { %1843 = vmatpush3.msra.mxu0 %v2480_v46  ;;  %1807 = vmatprep.subr.mxu1 %v1889_v4 }
 0x150   : > { %1844 = vmatprep.subr.mxu0 %v1889_v4  ;;  %1808 = vmatpush3.msra.mxu1 %v2264_v63 }
 0x151   : > { %1845 = vmatpush3.msra.mxu0 %v2489_v8  ;;  %1809 = vmatprep.subr.mxu1 %v1889_v4  ;;  %v1195_v8 = vadd.s32 %v1194_v7, %v1166_v40 }
 0x152   : > { %1846 = vmatprep.subr.mxu0 %v1889_v4  ;;  %1810 = vmatpush3.msra.mxu1 %v2278_v1 }
 0x153   : > { %1847 = vmatpush3.msra.mxu0 %v2498_v11  ;;  %1811 = vmatprep.subr.mxu1 %v1889_v4 }
 0x154   : > { %1848 = vmatprep.subr.mxu0 %v1889_v4  ;;  %1812 = vmatpush3.msra.mxu1 %v2292_v3 }
 0x155   : > { %1849 = vmatpush3.msra.mxu0 %v2507_v14  ;;  %1813 = vmatprep.subr.mxu1 %v1889_v4  ;;  %v1196_v14 = vmul.u32 2654435769, %v1195_v8 }
 0x156   : > { %1850 = vmatprep.subr.mxu0 %v1889_v4  ;;  %1814 = vmatpush3.msra.mxu1 %v2306_v6 }
 0x157   : > { %1851 = vmatpush3.msra.mxu0 %v2516_v16  ;;  %1815 = vmatprep.subr.mxu1 %v1889_v4 }
 0x158   : > { %1852 = vmatprep.subr.mxu0 %v1889_v4  ;;  %1816 = vmatpush3.msra.mxu1 %v2320_v10 }
 0x159   : > { %1853 = vmatpush3.msra.mxu0 %v2525_v18  ;;  %1817 = vmatprep.subr.mxu1 %v1889_v4 }
 0x15a   : > { %1854 = vmatprep.subr.mxu0 %v1889_v4  ;;  %1818 = vmatpush3.msra.mxu1 %v2334_v44  ;;  %v1340_v44 = vld [vmem:[%s2769_s5] ss:$0 sm:$0xff] }
 0x15b   : > { %1855 = vmatpush3.msra.mxu0 %v2534_v20  ;;  %1819 = vmatprep.subr.mxu1 %v1889_v4 }
 0x15c   : > { %1856 = vmatprep.subr.mxu0 %v1889_v4  ;;  %1820 = vmatpush3.msra.mxu1 %v2789_v13 }
 0x15d   : > { %1857 = vmatpush3.msra.mxu0 %v2543_v22  ;;  %1821 = vmatprep.subr.mxu1 %v1889_v4 }
 0x15e   : > { %1858 = vmatprep.subr.mxu0 %v1889_v4  ;;  %1822 = vmatpush3.msra.mxu1 %v2790_v15 }
 0x15f   : > { %1859 = vmatpush3.msra.mxu0 %v2552_v24  ;;  %1823 = vmatprep.subr.mxu1 %v1889_v4 }
 0x160   : > { %1860 = vmatprep.subr.mxu0 %v1889_v4  ;;  %1824 = vmatpush3.msra.mxu1 %v2791_v17 }
 0x161   : > { %1861 = vmatpush3.msra.mxu0 %v2561_v29  ;;  %1825 = vmatprep.subr.mxu1 %v1889_v4 }
 0x162   : > { %1862 = vmatprep.subr.mxu0 %v1889_v4  ;;  %1826 = vmatpush3.msra.mxu1 %v2792_v19 }
 0x163   : > { %1863 = vmatpush3.msra.mxu0 %v2570_v31  ;;  %1827 = vmatprep.subr.mxu1 %v1889_v4 }
 0x164   : > { %1864 = vmatprep.subr.mxu0 %v1889_v4  ;;  %1828 = vmatpush3.msra.mxu1 %v2793_v21 }
 0x165   : > { %1865 = vmatpush3.msra.mxu0 %v2579_v33  ;;  %1829 = vmatprep.subr.mxu1 %v1889_v4 }
 0x166   : > { %1866 = vmatprep.subr.mxu0 %v1889_v4  ;;  %1830 = vmatpush3.msra.mxu1 %v2794_v23 }
 0x167   : > { %1867 = vmatpush3.msra.mxu0 %v2590_v35  ;;  %1868 = vmatprep.mubr.msk.f32.mxu0 %vm1890_vm1, %v1889_v4 }
 0x168   : > { %1831 = vmatprep.subr.mxu1 %v1889_v4  ;;  %1869 = vmatmul.mubr.f32.vlgmr.msra.gmra.mxu0 %v1079_v25 }
 0x169   : > { %1832 = vmatpush3.msra.mxu1 %v2795_v26  ;;  %1833 = vmatprep.mubr.msk.f32.mxu1 %vm1890_vm1, %v1889_v4  ;;  %v1174_v4 = vstv %s1173_s8 }
 0x16a   : > { %1834 = vmatmul.mubr.f32.vlgmr.msra.gmra.mxu1 %v2602_v37  ;;  %v1175_v57 = vadd.s32 %v1174_v4, %v1172_v43  ;;  %v1197_v20 = vadd.s32 %v1196_v14, %v1174_v4 }
 0x16c   : > { %v1176_v59 = vshrl.u32 %v1175_v57, 16  ;;  %v1198_v24 = vshrl.u32 %v1197_v20, 16 }
 0x16e   : > { %v1177_v60 = vxor.u32 %v1176_v59, %v1175_v57  ;;  %v1199_v29 = vxor.u32 %v1198_v24, %v1197_v20 }
 0x170   : > { %v1178_v61 = vmul.u32 2146121005, %v1177_v60  ;;  %v1200_v31 = vmul.u32 2146121005, %v1199_v29 }
 0x172   : > { %v1179_v62 = vshrl.u32 %v1178_v61, 15  ;;  %v1201_v33 = vshrl.u32 %v1200_v31, 15 }
 0x174   : > { %v1180_v63 = vxor.u32 %v1179_v62, %v1178_v61  ;;  %v1202_v35 = vxor.u32 %v1201_v33, %v1200_v31 }
 0x176   : > { %v1181_v0 = vmul.u32 2221713035, %v1180_v63  ;;  %v1203_v37 = vmul.u32 2221713035, %v1202_v35 }
 0x178   : > { %v1182_v2 = vshrl.u32 %v1181_v0, 16  ;;  %v1204_v15 = vshrl.u32 %v1203_v37, 16 }
 0x17a   : > { %v1183_v6 = vxor.u32 %v1182_v2, %v1181_v0  ;;  %v1205_v23 = vxor.u32 %v1204_v15, %v1203_v37 }
 0x17c   : > { %v1184_v46 = vshrl.u32 %v1183_v6, 31 }
 0x17e   : > { %vm1185_vm2 = vcmp.eq.s32.totalorder %v1184_v46, 1 }
 0x1a2   : > { %v526_v27 = vpop.f32.mrf.mxu0 }
 0x1a4   : > { %v456_v28 = vpop.f32.mrf.mxu1  ;;  %v1590_v30 = vpop.f32.mrf.mxu0 }
 0x1a5   : > { %v527_v1 = vadd.f32 %v526_v27, %v456_v28  ;;  %v1206_v30 = vshrl.u32 %v1205_v23, 31 }
 0x1a6   : > { %v1555_v32 = vpop.f32.mrf.mxu1 }
 0x1a7   : > { %vm1207_vm3 = vcmp.eq.s32.totalorder %v1206_v30, 1 }
 0x1c2   : > { %v703_v52 = vpop.f32.mrf.mxu0 }
 0x1c4   : > { %v1660_v54 = vpop.f32.mrf.mxu0 }
 0x1c5   : > { %v614_v55 = vpop.f32.mrf.mxu1 }
 0x1c6   : > { %v618_v3 = vadd.f32 %v614_v55, %v527_v1 }
 0x1c7   : > { %v1625_v58 = vpop.f32.mrf.mxu1 }
 0x1c8   : > { %v707_v9 = vadd.f32 %v703_v52, %v618_v3 }
 0x1e4   : > { %v863_v5 = vpop.f32.mrf.mxu0 }
 0x1e6   : > { %v1730_v10 = vpop.f32.mrf.mxu0 }
 0x1e7   : > { %v792_v12 = vpop.f32.mrf.mxu1 }
 0x1e8   : > { %v796_v45 = vadd.f32 %v792_v12, %v707_v9 }
 0x1e9   : > { %v1695_v47 = vpop.f32.mrf.mxu1 }
 0x1ea   : > { %v1158_v48 = vadd.f32 %v1340_v44, %v796_v45 }
 0x1ec   : > { %v1159_v49 = vmax.f32 %v1158_v48, 0.0 }
 0x1ee   : > { %v1186_v50 = vmul.f32 2.0, %v1159_v49 }
 0x1f0   : > { %v1187_v51 = vsel %vm1185_vm2, %v1186_v50, 0.0 }
 0x1f1   : > { %1188 = vst [vmem:[%s2754_s15] sm:$0xff] %v1187_v51 }
 0x206   : > { %v1003_v11 = vpop.f32.mrf.mxu0 }
 0x208   : > { %v1800_v16 = vpop.f32.mrf.mxu0 }
 0x209   : > { %v933_v18 = vpop.f32.mrf.mxu1 }
 0x20a   : > { %v934_v13 = vadd.f32 %v933_v18, %v863_v5 }
 0x20b   : > { %v1765_v22 = vpop.f32.mrf.mxu1 }
 0x20c   : > { %v1007_v19 = vadd.f32 %v1003_v11, %v934_v13 }
 0x228   : > { %v1146_v17 = vpop.f32.mrf.mxu0 }
 0x22a   : > { %v1074_v21 = vpop.f32.mrf.mxu1  ;;  %v1870_v25 = vpop.f32.mrf.mxu0 }
 0x22b   : > { %v1078_v26 = vadd.f32 %v1074_v21, %v1007_v19 }
 0x22c   : > { %v1835_v27 = vpop.f32.mrf.mxu1 }
 0x22d   : > { %v1150_v28 = vadd.f32 %v1146_v17, %v1078_v26 }
 0x22f   : > { %v1160_v32 = vadd.f32 %v1340_v44, %v1150_v28 }
 0x231   : > { %v1161_v34 = vmax.f32 %v1160_v32, 0.0 }
 0x233   : > { %v1208_v36 = vmul.f32 2.0, %v1161_v34 }
 0x235   : > { %v1209_v38 = vsel %vm1207_vm3, %v1208_v36, 0.0 }
 0x236   : > { %1344 = vst [vmem:[%s2754_s15 + $0x8] sm:$0xff] %v1209_v38 }
 0x237 PF: > { %s17_s23 = sadd.s32 1, %s1887_s23  }
 0x238   : > { %p14_p4 = scmp.ge.s32.totalorder %s17_s23, 4  }
 0x23a   :  { %16 = sbr.rel (!%p14_p4) target bundleno = 2 (0x2), region = 80 }

</bundles_post_ra>
